<compile_context>
chip_gen: v7x
topology: tpu7x:2x2x1
jax: 0.10.0
libtpu: 0.0.40
codegen_flags: <defaults>
</compile_context>

<pallas_src>
import functools

import jax
import jax.numpy as jnp
from jax import lax
from jax.experimental import pallas as pl
from jax.experimental.pallas import tpu as pltpu

_LANE = 128


def _round_up(x, m):
    return (x + m - 1) // m * m


def _st_bilinear_kernel(feat_ref, mask_ref, wproj_ref, bproj_ref,
                        ln_g_ref, ln_b_ref, we1_ref, out_ref,
                        *, num_heads, msg, gu, gm):
    """One grid step = G batch elements x all H heads (fully unrolled)."""
    H, M, GU, GM = num_heads, msg, gu, gm
    G = feat_ref.shape[0]
    grp = 2 * GU + GM            # per-head lane-group width in the fused proj
    inv_m = 1.0 / M

    # Hoisted loads; constant index_maps mean these blocks are DMA'd once.
    w_proj = wproj_ref[...]       # [E, H*grp]  compute dtype
    b_proj = bproj_ref[...]       # [1, H*grp]  f32
    ln_g = ln_g_ref[...]          # [H, 1, GM]  f32 (zero on padded lanes)
    ln_b = ln_b_ref[...]          # [H, 1, GM]  f32 (zero on padded lanes)
    we1 = we1_ref[...]            # [H, GM, E]  compute dtype (zero pad rows)
    cdt = w_proj.dtype            # MXU operand dtype (f32 or bf16)

    for g in range(G):
        feat = feat_ref[g]        # [L, E], compute dtype

        # Additive mask bias built once per batch element (select -> add).
        # Finite -1e30 => fully-masked rows give a uniform attention row
        # instead of the reference NaN (documented semantic divergence).
        mask_add = mask_ref[g].astype(jnp.float32) * (-1e30)          # [L, L]

        # Fused U|V|W_e2 projection for all heads: one wide MXU pass, f32 acc.
        proj = jnp.dot(feat, w_proj,
                       preferred_element_type=jnp.float32) + b_proj   # [L, H*grp]

        acc = None
        for h in range(H):
            base = h * grp
            f_u = proj[:, base:base + GU]                    # [L, GU] f32
            f_v = proj[:, base + GU:base + 2 * GU]           # [L, GU] f32
            f_w2 = proj[:, base + 2 * GU:base + grp]         # [L, GM] f32

            # Bilinear logits; the zero-padded lanes contribute exactly 0.
            uv = lax.dot_general(
                f_u.astype(cdt), f_v.astype(cdt),
                (((1,), (1,)), ((), ())),
                preferred_element_type=jnp.float32)           # [L, L] f32
            uv = uv + mask_add

            # Unnormalized softmax: LayerNorm below is invariant to the
            # per-row positive scale, so 1/denom is folded into eps exactly.
            row_max = jnp.max(uv, axis=-1, keepdims=True)
            p = jnp.exp(uv - row_max)                         # [L, L] f32
            denom = jnp.sum(p, axis=-1, keepdims=True)        # [L, 1]  f32

            f_e = jnp.dot(p.astype(cdt), f_w2.astype(cdt),
                          preferred_element_type=jnp.float32)  # [L, GM] f32

            # LayerNorm over the M real lanes (padded lanes are exactly 0):
            # mean/var via sums over all GM lanes divided by M, var as
            # E[x^2]-mu^2 so the zero padding drops out; the deferred softmax
            # normalization enters only as eps -> eps * denom^2 (exact).
            mu = jnp.sum(f_e, axis=-1, keepdims=True) * inv_m
            var = jnp.sum(f_e * f_e, axis=-1, keepdims=True) * inv_m - mu * mu
            f_ln = (f_e - mu) * lax.rsqrt(var + 1e-5 * denom * denom)
            f_ln = jnp.maximum(f_ln * ln_g[h] + ln_b[h], 0.0)  # pad lanes -> 0

            # Head-sum fusion: accumulate in f32, no concat / stacked matmul.
            h_out = jnp.dot(f_ln.astype(cdt), we1[h],
                            preferred_element_type=jnp.float32)  # [L, E]
            acc = h_out if acc is None else acc + h_out

        out_ref[g] = acc


def _pack_params(params, compute_dtype):
    """Fold w_a into U, zero-pad each head's U/V/We2 group to 128 lanes."""
    u_w, u_b = params["u_w"], params["u_b"]       # [H,E,E], [H,1,E]
    v_w, v_b = params["v_w"], params["v_b"]       # [H,E,E], [H,1,E]
    w_a = params["w_a"]                           # [H,1,E]
    we2 = params["we2"]                           # [H,E,M]
    we1 = params["we1"]                           # [H,M,E]
    ln_g, ln_b = params["ln_g"], params["ln_b"]   # [H,1,M]
    H, E, M = we2.shape
    GU, GM = _round_up(E, _LANE), _round_up(M, _LANE)

    # w_a scales U's *output* features -> fold into weight and bias.
    uw_s = (u_w * w_a).astype(jnp.float32)
    ub_s = (u_b * w_a).astype(jnp.float32)

    def pad_last(x, width):
        return jnp.pad(x, [(0, 0)] * (x.ndim - 1) + [(0, width - x.shape[-1])])

    uw_p = pad_last(uw_s, GU)                          # [H, E, GU]
    vw_p = pad_last(v_w.astype(jnp.float32), GU)       # [H, E, GU]
    w2_p = pad_last(we2.astype(jnp.float32), GM)       # [H, E, GM]
    ub_p = pad_last(ub_s, GU)                          # [H, 1, GU]
    vb_p = pad_last(v_b.astype(jnp.float32), GU)       # [H, 1, GU]
    zb_p = jnp.zeros((H, 1, GM), jnp.float32)

    w_proj = jnp.concatenate(
        [jnp.concatenate([uw_p[h], vw_p[h], w2_p[h]], axis=1) for h in range(H)],
        axis=1)                                        # [E, H*(2*GU+GM)]
    b_proj = jnp.concatenate(
        [jnp.concatenate([ub_p[h], vb_p[h], zb_p[h]], axis=1) for h in range(H)],
        axis=1)                                        # [1, H*(2*GU+GM)]

    return {
        "w_proj": w_proj.astype(compute_dtype),
        "b_proj": b_proj,                                                # f32
        "we1": jnp.pad(we1, ((0, 0), (0, GM - M), (0, 0))).astype(compute_dtype),
        "ln_g": pad_last(ln_g.astype(jnp.float32), GM),                  # [H,1,GM]
        "ln_b": pad_last(ln_b.astype(jnp.float32), GM),                  # [H,1,GM]
    }


def _pick_group(B, L, P, H, budget_bytes=4 << 20, max_group=8):
    """Largest divisor of B (capped) whose per-step intermediates fit a budget."""
    per_b = (8 * H + 8) * L * L + 8 * L * P + 2048
    g = int(max(1, min(B, max_group, budget_bytes // max(per_b, 1))))
    while B % g:
        g -= 1
    return g


def multihead_st_bilinear(feature, mask, params, T, fusion_method="sum",
                          shortcut_connection=False,
                          compute_dtype=jnp.bfloat16, batch_group=None):
    """feature: [B*T, N, E]; mask: [B, T*N, T*N] bool (True = masked out).

    The leading B*T axis is assumed ordered (B, T), matching the PyTorch
    module's feature.reshape(B, T*N, -1).
    """
    if fusion_method != "sum":
        raise NotImplementedError("only fusion_method='sum' is implemented")

    BT, N, E = feature.shape
    B = BT // T
    L = T * N
    H, _, M = params["we2"].shape
    GU, GM = _round_up(E, _LANE), _round_up(M, _LANE)
    P = H * (2 * GU + GM)

    packed = _pack_params(params, compute_dtype)
    feat = feature.reshape(B, L, E).astype(compute_dtype)
    mask_i8 = mask.astype(jnp.int8)      # 1 byte/elem for the only O(L^2) input

    G = batch_group if batch_group is not None else _pick_group(B, L, P, H)
    assert B % G == 0, "batch_group must divide B"

    kernel = functools.partial(_st_bilinear_kernel,
                               num_heads=H, msg=M, gu=GU, gm=GM)

    batch_map = lambda b: (b, 0, 0)
    const2 = lambda b: (0, 0)
    const3 = lambda b: (0, 0, 0)

    out = pl.pallas_call(
        kernel,
        out_shape=jax.ShapeDtypeStruct((B, L, E), jnp.float32),
        grid_spec=pltpu.PrefetchScalarGridSpec(
            num_scalar_prefetch=0,
            grid=(B // G,),
            in_specs=[
                pl.BlockSpec((G, L, E), batch_map),     # feature
                pl.BlockSpec((G, L, L), batch_map),     # mask (int8)
                pl.BlockSpec((E, P), const2),           # fused U|V|We2 weight
                pl.BlockSpec((1, P), const2),           # fused bias (f32)
                pl.BlockSpec((H, 1, GM), const3),       # LN gamma (padded)
                pl.BlockSpec((H, 1, GM), const3),       # LN beta  (padded)
                pl.BlockSpec((H, GM, E), const3),       # W_e1 (padded rows)
            ],
            out_specs=pl.BlockSpec((G, L, E), batch_map),
        ),
        compiler_params=pltpu.CompilerParams(
            dimension_semantics=("parallel",)),
    )(feat, mask_i8, packed["w_proj"], packed["b_proj"],
      packed["ln_g"], packed["ln_b"], packed["we1"])

    out = out.reshape(BT, N, E)
    if shortcut_connection:
        out = feature.astype(jnp.float32) + out
    return out


def _reference(feature, mask, params, T, shortcut_connection=False):
    """Pure-JAX f32 reference replicating the PyTorch forward (fusion='sum')."""
    BT, N, E = feature.shape
    B = BT // T
    L = T * N
    H = params["u_w"].shape[0]
    feat = feature.reshape(B, L, E).astype(jnp.float32)

    total = jnp.zeros((B, L, E), jnp.float32)
    for h in range(H):
        f_u = feat @ params["u_w"][h] + params["u_b"][h]
        f_v = feat @ params["v_w"][h] + params["v_b"][h]
        f_u = f_u * params["w_a"][h]
        uv = jnp.einsum("ble,bke->blk", f_u, f_v)
        uv = jnp.where(mask, -jnp.inf, uv)
        attn = jax.nn.softmax(uv, axis=-1)
        f_w2 = feat @ params["we2"][h]
        f_e = jnp.einsum("blk,bkm->blm", attn, f_w2)
        mu = jnp.mean(f_e, axis=-1, keepdims=True)
        var = jnp.mean(jnp.square(f_e - mu), axis=-1, keepdims=True)
        f_ln = (f_e - mu) * lax.rsqrt(var + 1e-5)
        f_ln = f_ln * params["ln_g"][h] + params["ln_b"][h]
        f_ln = jnp.maximum(f_ln, 0.0)
        total = total + f_ln @ params["we1"][h]
    out = total.reshape(BT, N, E)
    if shortcut_connection:
        out = feature.astype(jnp.float32) + out
    return out


def _make_params(key, num_heads, emb_fea_num, message_fea_num):
    """Deterministic synthetic parameters; linear weights stored as [in, out]."""
    E, M, H = emb_fea_num, message_fea_num, num_heads
    ks = jax.random.split(key, 7)
    scale_e = 1.0 / jnp.sqrt(jnp.float32(E))
    scale_m = 1.0 / jnp.sqrt(jnp.float32(M))
    return {
        "u_w": jax.random.normal(ks[0], (H, E, E), jnp.float32) * scale_e,
        "u_b": jax.random.normal(ks[1], (H, 1, E), jnp.float32) * scale_e,
        "v_w": jax.random.normal(ks[2], (H, E, E), jnp.float32) * scale_e,
        "v_b": jax.random.normal(ks[3], (H, 1, E), jnp.float32) * scale_e,
        # kaiming_normal_ on a [1, E] tensor: std = sqrt(2 / E)
        "w_a": jax.random.normal(ks[4], (H, 1, E), jnp.float32)
               * jnp.sqrt(2.0 / jnp.float32(E)),
        "we2": jax.random.normal(ks[5], (H, E, M), jnp.float32) * scale_e,
        "we1": jax.random.normal(ks[6], (H, M, E), jnp.float32) * scale_m,
        # PyTorch LayerNorm defaults: weight = 1, bias = 0
        "ln_g": jnp.ones((H, 1, M), jnp.float32),
        "ln_b": jnp.zeros((H, 1, M), jnp.float32),
    }


if __name__ == "__main__":
    # Small shapes consistent with the module: emb=32, message=16, heads=2, T=3.
    E, M, H, T = 32, 16, 2, 3
    B, N = 2, 4
    L = T * N

    key = jax.random.PRNGKey(0)
    k_feat, k_mask, k_par = jax.random.split(key, 3)

    feature = jax.random.normal(k_feat, (B * T, N, E), jnp.float32)
    # Boolean mask over [B, T*N, T*N]; True => masked out. Keep the diagonal
    # unmasked so no softmax row is fully masked (matches PyTorch behavior).
    mask = jax.random.bernoulli(k_mask, p=0.2, shape=(B, L, L))
    eye = jnp.eye(L, dtype=bool)[None, :, :]
    mask = jnp.where(eye, False, mask)

    params = _make_params(k_par, H, E, M)

    # f32 compute path, with shortcut connection: near-exact parity with ref.
    out = multihead_st_bilinear(feature, mask, params, T,
                                fusion_method="sum", shortcut_connection=True,
                                compute_dtype=jnp.float32)
    out = jax.block_until_ready(out)
    ref = _reference(feature, mask, params, T, shortcut_connection=True)
    assert out.shape == (B * T, N, E)
    assert bool(jnp.isfinite(out).all())
    assert jnp.allclose(out, ref, atol=5e-3, rtol=5e-3), "f32 mismatch vs ref"

    # bf16 MXU-operand path (f32 accumulation + f32 softmax/LN math).
    out_bf = multihead_st_bilinear(feature, mask, params, T,
                                   fusion_method="sum",
                                   shortcut_connection=False,
                                   compute_dtype=jnp.bfloat16)
    out_bf = jax.block_until_ready(out_bf)
    ref_ns = _reference(feature, mask, params, T, shortcut_connection=False)
    rel = jnp.linalg.norm(out_bf - ref_ns) / jnp.linalg.norm(ref_ns)
    assert bool(jnp.isfinite(out_bf).all())
    assert float(rel) < 8e-2, f"bf16 path relative error too large: {rel}"

    print("KERNEL_OK")
</pallas_src>

<mosaic_0001>
module attributes {stable_mosaic.version = 11 : i64} {
  func.func @_st_bilinear_kernel(%arg0: i32, %arg1: memref<2x12x32xf32, #tpu.memory_space<vmem>>, %arg2: memref<2x12x12xi8, #tpu.memory_space<vmem>>, %arg3: memref<32x768xf32, #tpu.memory_space<vmem>>, %arg4: memref<1x768xf32, #tpu.memory_space<vmem>>, %arg5: memref<2x1x128xf32, #tpu.memory_space<vmem>>, %arg6: memref<2x1x128xf32, #tpu.memory_space<vmem>>, %arg7: memref<2x128x32xf32, #tpu.memory_space<vmem>>, %arg8: memref<2x12x32xf32, #tpu.memory_space<vmem>>) attributes {dimension_semantics = [#tpu.dimension_semantics<parallel>], iteration_bounds = array<i64: 1>, scalar_prefetch = 0 : i64, scratch_operands = 0 : i64, tpu.core_type = #tpu.core_type<tc>, window_params = [{transform_indices = @transform_0, window_bounds = array<i64: 2, 12, 32>}, {transform_indices = @transform_1, window_bounds = array<i64: 2, 12, 12>}, {pipeline_mode = #tpu.pipeline_mode<synchronous>, transform_indices = @transform_2, window_bounds = array<i64: 32, 768>}, {pipeline_mode = #tpu.pipeline_mode<synchronous>, transform_indices = @transform_3, window_bounds = array<i64: 1, 768>}, {pipeline_mode = #tpu.pipeline_mode<synchronous>, transform_indices = @transform_4, window_bounds = array<i64: 2, 1, 128>}, {pipeline_mode = #tpu.pipeline_mode<synchronous>, transform_indices = @transform_5, window_bounds = array<i64: 2, 1, 128>}, {pipeline_mode = #tpu.pipeline_mode<synchronous>, transform_indices = @transform_6, window_bounds = array<i64: 2, 128, 32>}, {transform_indices = @transform_7, window_bounds = array<i64: 2, 12, 32>}]} {
    %c0 = arith.constant 0 : index
    %c0_0 = arith.constant 0 : index
    %0 = vector.load %arg3[%c0, %c0_0] : memref<32x768xf32, #tpu.memory_space<vmem>>, vector<32x768xf32>
    %c0_1 = arith.constant 0 : index
    %c0_2 = arith.constant 0 : index
    %1 = vector.load %arg4[%c0_1, %c0_2] : memref<1x768xf32, #tpu.memory_space<vmem>>, vector<1x768xf32>
    %c0_3 = arith.constant 0 : index
    %c0_4 = arith.constant 0 : index
    %c0_5 = arith.constant 0 : index
    %2 = vector.load %arg5[%c0_3, %c0_4, %c0_5] : memref<2x1x128xf32, #tpu.memory_space<vmem>>, vector<2x1x128xf32>
    %c0_6 = arith.constant 0 : index
    %c0_7 = arith.constant 0 : index
    %c0_8 = arith.constant 0 : index
    %3 = vector.load %arg6[%c0_6, %c0_7, %c0_8] : memref<2x1x128xf32, #tpu.memory_space<vmem>>, vector<2x1x128xf32>
    %c0_9 = arith.constant 0 : index
    %c0_10 = arith.constant 0 : index
    %c0_11 = arith.constant 0 : index
    %4 = vector.load %arg7[%c0_9, %c0_10, %c0_11] : memref<2x128x32xf32, #tpu.memory_space<vmem>>, vector<2x128x32xf32>
    %c0_12 = arith.constant 0 : index
    %c0_13 = arith.constant 0 : index
    %c0_14 = arith.constant 0 : index
    %5 = vector.load %arg1[%c0_12, %c0_13, %c0_14] : memref<2x12x32xf32, #tpu.memory_space<vmem>>, vector<1x12x32xf32>
    %6 = vector.shape_cast %5 : vector<1x12x32xf32> to vector<12x32xf32>
    %c0_15 = arith.constant 0 : index
    %c0_16 = arith.constant 0 : index
    %c0_17 = arith.constant 0 : index
    %7 = vector.load %arg2[%c0_15, %c0_16, %c0_17] : memref<2x12x12xi8, #tpu.memory_space<vmem>>, vector<1x12x12xi8>
    %8 = vector.shape_cast %7 : vector<1x12x12xi8> to vector<12x12xi8>
    %9 = arith.sitofp %8 : vector<12x12xi8> to vector<12x12xf32>
    %cst = arith.constant -1.000000e+30 : f32
    %10 = vector.broadcast %cst : f32 to vector<12x12xf32>
    %11 = arith.mulf %9, %10 : vector<12x12xf32>
    %cst_18 = arith.constant dense<0.000000e+00> : vector<12x768xf32>
    %12 = tpu.matmul %6, %0, %cst_18 {dimension_numbers = #tpu.dot_dimension_numbers<[1], [0], [0], [1], [0, 0, 1, 1], [], []>} : vector<12x32xf32>, vector<32x768xf32>, vector<12x768xf32> -> vector<12x768xf32>
    %13 = vector.broadcast %1 : vector<1x768xf32> to vector<12x768xf32>
    %14 = arith.addf %12, %13 : vector<12x768xf32>
    %15 = vector.extract_strided_slice %14 {offsets = [0, 0], sizes = [12, 128], strides = [1, 1]} : vector<12x768xf32> to vector<12x128xf32>
    %16 = vector.extract_strided_slice %14 {offsets = [0, 128], sizes = [12, 128], strides = [1, 1]} : vector<12x768xf32> to vector<12x128xf32>
    %17 = vector.extract_strided_slice %14 {offsets = [0, 256], sizes = [12, 128], strides = [1, 1]} : vector<12x768xf32> to vector<12x128xf32>
    %cst_19 = arith.constant dense<0.000000e+00> : vector<12x12xf32>
    %18 = tpu.matmul %15, %16, %cst_19 {dimension_numbers = #tpu.dot_dimension_numbers<[1], [1], [0], [0], [0, 0, 1, 0], [], []>} : vector<12x128xf32>, vector<12x128xf32>, vector<12x12xf32> -> vector<12x12xf32>
    %19 = arith.addf %18, %11 : vector<12x12xf32>
    %cst_20 = arith.constant dense<0xFF800000> : vector<12xf32>
    %20 = vector.multi_reduction <maximumf>, %19, %cst_20 [1] : vector<12x12xf32> to vector<12xf32>
    %21 = vector.shape_cast %20 : vector<12xf32> to vector<12x1xf32>
    %22 = vector.broadcast %21 : vector<12x1xf32> to vector<12x12xf32>
    %23 = arith.subf %19, %22 : vector<12x12xf32>
    %24 = math.exp %23 : vector<12x12xf32>
    %cst_21 = arith.constant dense<0.000000e+00> : vector<12xf32>
    %25 = vector.multi_reduction <add>, %24, %cst_21 [1] : vector<12x12xf32> to vector<12xf32>
    %26 = vector.shape_cast %25 : vector<12xf32> to vector<12x1xf32>
    %cst_22 = arith.constant dense<0.000000e+00> : vector<12x128xf32>
    %27 = tpu.matmul %24, %17, %cst_22 {dimension_numbers = #tpu.dot_dimension_numbers<[1], [0], [0], [1], [0, 0, 1, 1], [], []>} : vector<12x12xf32>, vector<12x128xf32>, vector<12x128xf32> -> vector<12x128xf32>
    %cst_23 = arith.constant dense<0.000000e+00> : vector<12xf32>
    %28 = vector.multi_reduction <add>, %27, %cst_23 [1] : vector<12x128xf32> to vector<12xf32>
    %29 = vector.shape_cast %28 : vector<12xf32> to vector<12x1xf32>
    %cst_24 = arith.constant 6.250000e-02 : f32
    %30 = vector.broadcast %cst_24 : f32 to vector<12x1xf32>
    %31 = arith.mulf %29, %30 : vector<12x1xf32>
    %32 = arith.mulf %27, %27 : vector<12x128xf32>
    %cst_25 = arith.constant dense<0.000000e+00> : vector<12xf32>
    %33 = vector.multi_reduction <add>, %32, %cst_25 [1] : vector<12x128xf32> to vector<12xf32>
    %34 = vector.shape_cast %33 : vector<12xf32> to vector<12x1xf32>
    %cst_26 = arith.constant 6.250000e-02 : f32
    %35 = vector.broadcast %cst_26 : f32 to vector<12x1xf32>
    %36 = arith.mulf %34, %35 : vector<12x1xf32>
    %37 = arith.mulf %31, %31 : vector<12x1xf32>
    %38 = arith.subf %36, %37 : vector<12x1xf32>
    %39 = vector.broadcast %31 : vector<12x1xf32> to vector<12x128xf32>
    %40 = arith.subf %27, %39 : vector<12x128xf32>
    %cst_27 = arith.constant 9.99999974E-6 : f32
    %41 = vector.broadcast %cst_27 : f32 to vector<12x1xf32>
    %42 = arith.mulf %41, %26 : vector<12x1xf32>
    %43 = arith.mulf %42, %26 : vector<12x1xf32>
    %44 = arith.addf %38, %43 : vector<12x1xf32>
    %45 = math.rsqrt %44 : vector<12x1xf32>
    %46 = vector.broadcast %45 : vector<12x1xf32> to vector<12x128xf32>
    %47 = arith.mulf %40, %46 : vector<12x128xf32>
    %48 = vector.extract_strided_slice %2 {offsets = [0, 0, 0], sizes = [1, 1, 128], strides = [1, 1, 1]} : vector<2x1x128xf32> to vector<1x1x128xf32>
    %49 = vector.shape_cast %48 : vector<1x1x128xf32> to vector<1x128xf32>
    %50 = vector.broadcast %49 : vector<1x128xf32> to vector<12x128xf32>
    %51 = arith.mulf %47, %50 : vector<12x128xf32>
    %52 = vector.extract_strided_slice %3 {offsets = [0, 0, 0], sizes = [1, 1, 128], strides = [1, 1, 1]} : vector<2x1x128xf32> to vector<1x1x128xf32>
    %53 = vector.shape_cast %52 : vector<1x1x128xf32> to vector<1x128xf32>
    %54 = vector.broadcast %53 : vector<1x128xf32> to vector<12x128xf32>
    %55 = arith.addf %51, %54 : vector<12x128xf32>
    %cst_28 = arith.constant 0.000000e+00 : f32
    %56 = vector.broadcast %cst_28 : f32 to vector<12x128xf32>
    %57 = arith.maximumf %55, %56 : vector<12x128xf32>
    %58 = vector.extract_strided_slice %4 {offsets = [0, 0, 0], sizes = [1, 128, 32], strides = [1, 1, 1]} : vector<2x128x32xf32> to vector<1x128x32xf32>
    %59 = vector.shape_cast %58 : vector<1x128x32xf32> to vector<128x32xf32>
    %cst_29 = arith.constant dense<0.000000e+00> : vector<12x32xf32>
    %60 = tpu.matmul %57, %59, %cst_29 {dimension_numbers = #tpu.dot_dimension_numbers<[1], [0], [0], [1], [0, 0, 1, 1], [], []>} : vector<12x128xf32>, vector<128x32xf32>, vector<12x32xf32> -> vector<12x32xf32>
    %61 = vector.extract_strided_slice %14 {offsets = [0, 384], sizes = [12, 128], strides = [1, 1]} : vector<12x768xf32> to vector<12x128xf32>
    %62 = vector.extract_strided_slice %14 {offsets = [0, 512], sizes = [12, 128], strides = [1, 1]} : vector<12x768xf32> to vector<12x128xf32>
    %63 = vector.extract_strided_slice %14 {offsets = [0, 640], sizes = [12, 128], strides = [1, 1]} : vector<12x768xf32> to vector<12x128xf32>
    %cst_30 = arith.constant dense<0.000000e+00> : vector<12x12xf32>
    %64 = tpu.matmul %61, %62, %cst_30 {dimension_numbers = #tpu.dot_dimension_numbers<[1], [1], [0], [0], [0, 0, 1, 0], [], []>} : vector<12x128xf32>, vector<12x128xf32>, vector<12x12xf32> -> vector<12x12xf32>
    %65 = arith.addf %64, %11 : vector<12x12xf32>
    %cst_31 = arith.constant dense<0xFF800000> : vector<12xf32>
    %66 = vector.multi_reduction <maximumf>, %65, %cst_31 [1] : vector<12x12xf32> to vector<12xf32>
    %67 = vector.shape_cast %66 : vector<12xf32> to vector<12x1xf32>
    %68 = vector.broadcast %67 : vector<12x1xf32> to vector<12x12xf32>
    %69 = arith.subf %65, %68 : vector<12x12xf32>
    %70 = math.exp %69 : vector<12x12xf32>
    %cst_32 = arith.constant dense<0.000000e+00> : vector<12xf32>
    %71 = vector.multi_reduction <add>, %70, %cst_32 [1] : vector<12x12xf32> to vector<12xf32>
    %72 = vector.shape_cast %71 : vector<12xf32> to vector<12x1xf32>
    %cst_33 = arith.constant dense<0.000000e+00> : vector<12x128xf32>
    %73 = tpu.matmul %70, %63, %cst_33 {dimension_numbers = #tpu.dot_dimension_numbers<[1], [0], [0], [1], [0, 0, 1, 1], [], []>} : vector<12x12xf32>, vector<12x128xf32>, vector<12x128xf32> -> vector<12x128xf32>
    %cst_34 = arith.constant dense<0.000000e+00> : vector<12xf32>
    %74 = vector.multi_reduction <add>, %73, %cst_34 [1] : vector<12x128xf32> to vector<12xf32>
    %75 = vector.shape_cast %74 : vector<12xf32> to vector<12x1xf32>
    %cst_35 = arith.constant 6.250000e-02 : f32
    %76 = vector.broadcast %cst_35 : f32 to vector<12x1xf32>
    %77 = arith.mulf %75, %76 : vector<12x1xf32>
    %78 = arith.mulf %73, %73 : vector<12x128xf32>
    %cst_36 = arith.constant dense<0.000000e+00> : vector<12xf32>
    %79 = vector.multi_reduction <add>, %78, %cst_36 [1] : vector<12x128xf32> to vector<12xf32>
    %80 = vector.shape_cast %79 : vector<12xf32> to vector<12x1xf32>
    %cst_37 = arith.constant 6.250000e-02 : f32
    %81 = vector.broadcast %cst_37 : f32 to vector<12x1xf32>
    %82 = arith.mulf %80, %81 : vector<12x1xf32>
    %83 = arith.mulf %77, %77 : vector<12x1xf32>
    %84 = arith.subf %82, %83 : vector<12x1xf32>
    %85 = vector.broadcast %77 : vector<12x1xf32> to vector<12x128xf32>
    %86 = arith.subf %73, %85 : vector<12x128xf32>
    %cst_38 = arith.constant 9.99999974E-6 : f32
    %87 = vector.broadcast %cst_38 : f32 to vector<12x1xf32>
    %88 = arith.mulf %87, %72 : vector<12x1xf32>
    %89 = arith.mulf %88, %72 : vector<12x1xf32>
    %90 = arith.addf %84, %89 : vector<12x1xf32>
    %91 = math.rsqrt %90 : vector<12x1xf32>
    %92 = vector.broadcast %91 : vector<12x1xf32> to vector<12x128xf32>
    %93 = arith.mulf %86, %92 : vector<12x128xf32>
    %94 = vector.extract_strided_slice %2 {offsets = [1, 0, 0], sizes = [1, 1, 128], strides = [1, 1, 1]} : vector<2x1x128xf32> to vector<1x1x128xf32>
    %95 = vector.shape_cast %94 : vector<1x1x128xf32> to vector<1x128xf32>
    %96 = vector.broadcast %95 : vector<1x128xf32> to vector<12x128xf32>
    %97 = arith.mulf %93, %96 : vector<12x128xf32>
    %98 = vector.extract_strided_slice %3 {offsets = [1, 0, 0], sizes = [1, 1, 128], strides = [1, 1, 1]} : vector<2x1x128xf32> to vector<1x1x128xf32>
    %99 = vector.shape_cast %98 : vector<1x1x128xf32> to vector<1x128xf32>
    %100 = vector.broadcast %99 : vector<1x128xf32> to vector<12x128xf32>
    %101 = arith.addf %97, %100 : vector<12x128xf32>
    %cst_39 = arith.constant 0.000000e+00 : f32
    %102 = vector.broadcast %cst_39 : f32 to vector<12x128xf32>
    %103 = arith.maximumf %101, %102 : vector<12x128xf32>
    %104 = vector.extract_strided_slice %4 {offsets = [1, 0, 0], sizes = [1, 128, 32], strides = [1, 1, 1]} : vector<2x128x32xf32> to vector<1x128x32xf32>
    %105 = vector.shape_cast %104 : vector<1x128x32xf32> to vector<128x32xf32>
    %cst_40 = arith.constant dense<0.000000e+00> : vector<12x32xf32>
    %106 = tpu.matmul %103, %105, %cst_40 {dimension_numbers = #tpu.dot_dimension_numbers<[1], [0], [0], [1], [0, 0, 1, 1], [], []>} : vector<12x128xf32>, vector<128x32xf32>, vector<12x32xf32> -> vector<12x32xf32>
    %107 = arith.addf %60, %106 : vector<12x32xf32>
    %c0_41 = arith.constant 0 : index
    %c0_42 = arith.constant 0 : index
    %c0_43 = arith.constant 0 : index
    %108 = vector.load %arg8[%c0_41, %c0_42, %c0_43] : memref<2x12x32xf32, #tpu.memory_space<vmem>>, vector<1x12x32xf32>
    %109 = vector.shape_cast %108 : vector<1x12x32xf32> to vector<12x32xf32>
    %110 = vector.shape_cast %107 : vector<12x32xf32> to vector<1x12x32xf32>
    tpu.vector_store %arg8[%c0_41, %c0_42, %c0_43], %110 {strides = array<i32>} : memref<2x12x32xf32, #tpu.memory_space<vmem>>, vector<1x12x32xf32>,
    %c1 = arith.constant 1 : index
    %c0_44 = arith.constant 0 : index
    %c0_45 = arith.constant 0 : index
    %111 = vector.load %arg1[%c1, %c0_44, %c0_45] : memref<2x12x32xf32, #tpu.memory_space<vmem>>, vector<1x12x32xf32>
    %112 = vector.shape_cast %111 : vector<1x12x32xf32> to vector<12x32xf32>
    %c1_46 = arith.constant 1 : index
    %c0_47 = arith.constant 0 : index
    %c0_48 = arith.constant 0 : index
    %113 = vector.load %arg2[%c1_46, %c0_47, %c0_48] : memref<2x12x12xi8, #tpu.memory_space<vmem>>, vector<1x12x12xi8>
    %114 = vector.shape_cast %113 : vector<1x12x12xi8> to vector<12x12xi8>
    %115 = arith.sitofp %114 : vector<12x12xi8> to vector<12x12xf32>
    %cst_49 = arith.constant -1.000000e+30 : f32
    %116 = vector.broadcast %cst_49 : f32 to vector<12x12xf32>
    %117 = arith.mulf %115, %116 : vector<12x12xf32>
    %cst_50 = arith.constant dense<0.000000e+00> : vector<12x768xf32>
    %118 = tpu.matmul %112, %0, %cst_50 {dimension_numbers = #tpu.dot_dimension_numbers<[1], [0], [0], [1], [0, 0, 1, 1], [], []>} : vector<12x32xf32>, vector<32x768xf32>, vector<12x768xf32> -> vector<12x768xf32>
    %119 = vector.broadcast %1 : vector<1x768xf32> to vector<12x768xf32>
    %120 = arith.addf %118, %119 : vector<12x768xf32>
    %121 = vector.extract_strided_slice %120 {offsets = [0, 0], sizes = [12, 128], strides = [1, 1]} : vector<12x768xf32> to vector<12x128xf32>
    %122 = vector.extract_strided_slice %120 {offsets = [0, 128], sizes = [12, 128], strides = [1, 1]} : vector<12x768xf32> to vector<12x128xf32>
    %123 = vector.extract_strided_slice %120 {offsets = [0, 256], sizes = [12, 128], strides = [1, 1]} : vector<12x768xf32> to vector<12x128xf32>
    %cst_51 = arith.constant dense<0.000000e+00> : vector<12x12xf32>
    %124 = tpu.matmul %121, %122, %cst_51 {dimension_numbers = #tpu.dot_dimension_numbers<[1], [1], [0], [0], [0, 0, 1, 0], [], []>} : vector<12x128xf32>, vector<12x128xf32>, vector<12x12xf32> -> vector<12x12xf32>
    %125 = arith.addf %124, %117 : vector<12x12xf32>
    %cst_52 = arith.constant dense<0xFF800000> : vector<12xf32>
    %126 = vector.multi_reduction <maximumf>, %125, %cst_52 [1] : vector<12x12xf32> to vector<12xf32>
    %127 = vector.shape_cast %126 : vector<12xf32> to vector<12x1xf32>
    %128 = vector.broadcast %127 : vector<12x1xf32> to vector<12x12xf32>
    %129 = arith.subf %125, %128 : vector<12x12xf32>
    %130 = math.exp %129 : vector<12x12xf32>
    %cst_53 = arith.constant dense<0.000000e+00> : vector<12xf32>
    %131 = vector.multi_reduction <add>, %130, %cst_53 [1] : vector<12x12xf32> to vector<12xf32>
    %132 = vector.shape_cast %131 : vector<12xf32> to vector<12x1xf32>
    %cst_54 = arith.constant dense<0.000000e+00> : vector<12x128xf32>
    %133 = tpu.matmul %130, %123, %cst_54 {dimension_numbers = #tpu.dot_dimension_numbers<[1], [0], [0], [1], [0, 0, 1, 1], [], []>} : vector<12x12xf32>, vector<12x128xf32>, vector<12x128xf32> -> vector<12x128xf32>
    %cst_55 = arith.constant dense<0.000000e+00> : vector<12xf32>
    %134 = vector.multi_reduction <add>, %133, %cst_55 [1] : vector<12x128xf32> to vector<12xf32>
    %135 = vector.shape_cast %134 : vector<12xf32> to vector<12x1xf32>
    %cst_56 = arith.constant 6.250000e-02 : f32
    %136 = vector.broadcast %cst_56 : f32 to vector<12x1xf32>
    %137 = arith.mulf %135, %136 : vector<12x1xf32>
    %138 = arith.mulf %133, %133 : vector<12x128xf32>
    %cst_57 = arith.constant dense<0.000000e+00> : vector<12xf32>
    %139 = vector.multi_reduction <add>, %138, %cst_57 [1] : vector<12x128xf32> to vector<12xf32>
    %140 = vector.shape_cast %139 : vector<12xf32> to vector<12x1xf32>
    %cst_58 = arith.constant 6.250000e-02 : f32
    %141 = vector.broadcast %cst_58 : f32 to vector<12x1xf32>
    %142 = arith.mulf %140, %141 : vector<12x1xf32>
    %143 = arith.mulf %137, %137 : vector<12x1xf32>
    %144 = arith.subf %142, %143 : vector<12x1xf32>
    %145 = vector.broadcast %137 : vector<12x1xf32> to vector<12x128xf32>
    %146 = arith.subf %133, %145 : vector<12x128xf32>
    %cst_59 = arith.constant 9.99999974E-6 : f32
    %147 = vector.broadcast %cst_59 : f32 to vector<12x1xf32>
    %148 = arith.mulf %147, %132 : vector<12x1xf32>
    %149 = arith.mulf %148, %132 : vector<12x1xf32>
    %150 = arith.addf %144, %149 : vector<12x1xf32>
    %151 = math.rsqrt %150 : vector<12x1xf32>
    %152 = vector.broadcast %151 : vector<12x1xf32> to vector<12x128xf32>
    %153 = arith.mulf %146, %152 : vector<12x128xf32>
    %154 = vector.extract_strided_slice %2 {offsets = [0, 0, 0], sizes = [1, 1, 128], strides = [1, 1, 1]} : vector<2x1x128xf32> to vector<1x1x128xf32>
    %155 = vector.shape_cast %154 : vector<1x1x128xf32> to vector<1x128xf32>
    %156 = vector.broadcast %155 : vector<1x128xf32> to vector<12x128xf32>
    %157 = arith.mulf %153, %156 : vector<12x128xf32>
    %158 = vector.extract_strided_slice %3 {offsets = [0, 0, 0], sizes = [1, 1, 128], strides = [1, 1, 1]} : vector<2x1x128xf32> to vector<1x1x128xf32>
    %159 = vector.shape_cast %158 : vector<1x1x128xf32> to vector<1x128xf32>
    %160 = vector.broadcast %159 : vector<1x128xf32> to vector<12x128xf32>
    %161 = arith.addf %157, %160 : vector<12x128xf32>
    %cst_60 = arith.constant 0.000000e+00 : f32
    %162 = vector.broadcast %cst_60 : f32 to vector<12x128xf32>
    %163 = arith.maximumf %161, %162 : vector<12x128xf32>
    %164 = vector.extract_strided_slice %4 {offsets = [0, 0, 0], sizes = [1, 128, 32], strides = [1, 1, 1]} : vector<2x128x32xf32> to vector<1x128x32xf32>
    %165 = vector.shape_cast %164 : vector<1x128x32xf32> to vector<128x32xf32>
    %cst_61 = arith.constant dense<0.000000e+00> : vector<12x32xf32>
    %166 = tpu.matmul %163, %165, %cst_61 {dimension_numbers = #tpu.dot_dimension_numbers<[1], [0], [0], [1], [0, 0, 1, 1], [], []>} : vector<12x128xf32>, vector<128x32xf32>, vector<12x32xf32> -> vector<12x32xf32>
    %167 = vector.extract_strided_slice %120 {offsets = [0, 384], sizes = [12, 128], strides = [1, 1]} : vector<12x768xf32> to vector<12x128xf32>
    %168 = vector.extract_strided_slice %120 {offsets = [0, 512], sizes = [12, 128], strides = [1, 1]} : vector<12x768xf32> to vector<12x128xf32>
    %169 = vector.extract_strided_slice %120 {offsets = [0, 640], sizes = [12, 128], strides = [1, 1]} : vector<12x768xf32> to vector<12x128xf32>
    %cst_62 = arith.constant dense<0.000000e+00> : vector<12x12xf32>
    %170 = tpu.matmul %167, %168, %cst_62 {dimension_numbers = #tpu.dot_dimension_numbers<[1], [1], [0], [0], [0, 0, 1, 0], [], []>} : vector<12x128xf32>, vector<12x128xf32>, vector<12x12xf32> -> vector<12x12xf32>
    %171 = arith.addf %170, %117 : vector<12x12xf32>
    %cst_63 = arith.constant dense<0xFF800000> : vector<12xf32>
    %172 = vector.multi_reduction <maximumf>, %171, %cst_63 [1] : vector<12x12xf32> to vector<12xf32>
    %173 = vector.shape_cast %172 : vector<12xf32> to vector<12x1xf32>
    %174 = vector.broadcast %173 : vector<12x1xf32> to vector<12x12xf32>
    %175 = arith.subf %171, %174 : vector<12x12xf32>
    %176 = math.exp %175 : vector<12x12xf32>
    %cst_64 = arith.constant dense<0.000000e+00> : vector<12xf32>
    %177 = vector.multi_reduction <add>, %176, %cst_64 [1] : vector<12x12xf32> to vector<12xf32>
    %178 = vector.shape_cast %177 : vector<12xf32> to vector<12x1xf32>
    %cst_65 = arith.constant dense<0.000000e+00> : vector<12x128xf32>
    %179 = tpu.matmul %176, %169, %cst_65 {dimension_numbers = #tpu.dot_dimension_numbers<[1], [0], [0], [1], [0, 0, 1, 1], [], []>} : vector<12x12xf32>, vector<12x128xf32>, vector<12x128xf32> -> vector<12x128xf32>
    %cst_66 = arith.constant dense<0.000000e+00> : vector<12xf32>
    %180 = vector.multi_reduction <add>, %179, %cst_66 [1] : vector<12x128xf32> to vector<12xf32>
    %181 = vector.shape_cast %180 : vector<12xf32> to vector<12x1xf32>
    %cst_67 = arith.constant 6.250000e-02 : f32
    %182 = vector.broadcast %cst_67 : f32 to vector<12x1xf32>
    %183 = arith.mulf %181, %182 : vector<12x1xf32>
    %184 = arith.mulf %179, %179 : vector<12x128xf32>
    %cst_68 = arith.constant dense<0.000000e+00> : vector<12xf32>
    %185 = vector.multi_reduction <add>, %184, %cst_68 [1] : vector<12x128xf32> to vector<12xf32>
    %186 = vector.shape_cast %185 : vector<12xf32> to vector<12x1xf32>
    %cst_69 = arith.constant 6.250000e-02 : f32
    %187 = vector.broadcast %cst_69 : f32 to vector<12x1xf32>
    %188 = arith.mulf %186, %187 : vector<12x1xf32>
    %189 = arith.mulf %183, %183 : vector<12x1xf32>
    %190 = arith.subf %188, %189 : vector<12x1xf32>
    %191 = vector.broadcast %183 : vector<12x1xf32> to vector<12x128xf32>
    %192 = arith.subf %179, %191 : vector<12x128xf32>
    %cst_70 = arith.constant 9.99999974E-6 : f32
    %193 = vector.broadcast %cst_70 : f32 to vector<12x1xf32>
    %194 = arith.mulf %193, %178 : vector<12x1xf32>
    %195 = arith.mulf %194, %178 : vector<12x1xf32>
    %196 = arith.addf %190, %195 : vector<12x1xf32>
    %197 = math.rsqrt %196 : vector<12x1xf32>
    %198 = vector.broadcast %197 : vector<12x1xf32> to vector<12x128xf32>
    %199 = arith.mulf %192, %198 : vector<12x128xf32>
    %200 = vector.extract_strided_slice %2 {offsets = [1, 0, 0], sizes = [1, 1, 128], strides = [1, 1, 1]} : vector<2x1x128xf32> to vector<1x1x128xf32>
    %201 = vector.shape_cast %200 : vector<1x1x128xf32> to vector<1x128xf32>
    %202 = vector.broadcast %201 : vector<1x128xf32> to vector<12x128xf32>
    %203 = arith.mulf %199, %202 : vector<12x128xf32>
    %204 = vector.extract_strided_slice %3 {offsets = [1, 0, 0], sizes = [1, 1, 128], strides = [1, 1, 1]} : vector<2x1x128xf32> to vector<1x1x128xf32>
    %205 = vector.shape_cast %204 : vector<1x1x128xf32> to vector<1x128xf32>
    %206 = vector.broadcast %205 : vector<1x128xf32> to vector<12x128xf32>
    %207 = arith.addf %203, %206 : vector<12x128xf32>
    %cst_71 = arith.constant 0.000000e+00 : f32
    %208 = vector.broadcast %cst_71 : f32 to vector<12x128xf32>
    %209 = arith.maximumf %207, %208 : vector<12x128xf32>
    %210 = vector.extract_strided_slice %4 {offsets = [1, 0, 0], sizes = [1, 128, 32], strides = [1, 1, 1]} : vector<2x128x32xf32> to vector<1x128x32xf32>
    %211 = vector.shape_cast %210 : vector<1x128x32xf32> to vector<128x32xf32>
    %cst_72 = arith.constant dense<0.000000e+00> : vector<12x32xf32>
    %212 = tpu.matmul %209, %211, %cst_72 {dimension_numbers = #tpu.dot_dimension_numbers<[1], [0], [0], [1], [0, 0, 1, 1], [], []>} : vector<12x128xf32>, vector<128x32xf32>, vector<12x32xf32> -> vector<12x32xf32>
    %213 = arith.addf %166, %212 : vector<12x32xf32>
    %c1_73 = arith.constant 1 : index
    %c0_74 = arith.constant 0 : index
    %c0_75 = arith.constant 0 : index
    %214 = vector.load %arg8[%c1_73, %c0_74, %c0_75] : memref<2x12x32xf32, #tpu.memory_space<vmem>>, vector<1x12x32xf32>
    %215 = vector.shape_cast %214 : vector<1x12x32xf32> to vector<12x32xf32>
    %216 = vector.shape_cast %213 : vector<12x32xf32> to vector<1x12x32xf32>
    tpu.vector_store %arg8[%c1_73, %c0_74, %c0_75], %216 {strides = array<i32>} : memref<2x12x32xf32, #tpu.memory_space<vmem>>, vector<1x12x32xf32>,
    return
  }
  func.func @transform_0(%arg0: i32) -> (i32, i32, i32) {
    %c0_i32 = arith.constant 0 : i32
    %c0_i32_0 = arith.constant 0 : i32
    %c0_i32_1 = arith.constant 0 : i32
    return %arg0, %c0_i32, %c0_i32_0 : i32, i32, i32
  }
  func.func @transform_1(%arg0: i32) -> (i32, i32, i32) {
    %c0_i32 = arith.constant 0 : i32
    %c0_i32_0 = arith.constant 0 : i32
    %c0_i32_1 = arith.constant 0 : i32
    return %arg0, %c0_i32, %c0_i32_0 : i32, i32, i32
  }
  func.func @transform_2(%arg0: i32) -> (i32, i32) {
    %c0_i32 = arith.constant 0 : i32
    %c0_i32_0 = arith.constant 0 : i32
    %c0_i32_1 = arith.constant 0 : i32
    return %c0_i32, %c0_i32_0 : i32, i32
  }
  func.func @transform_3(%arg0: i32) -> (i32, i32) {
    %c0_i32 = arith.constant 0 : i32
    %c0_i32_0 = arith.constant 0 : i32
    %c0_i32_1 = arith.constant 0 : i32
    return %c0_i32, %c0_i32_0 : i32, i32
  }
  func.func @transform_4(%arg0: i32) -> (i32, i32, i32) {
    %c0_i32 = arith.constant 0 : i32
    %c0_i32_0 = arith.constant 0 : i32
    %c0_i32_1 = arith.constant 0 : i32
    %c0_i32_2 = arith.constant 0 : i32
    return %c0_i32, %c0_i32_0, %c0_i32_1 : i32, i32, i32
  }
  func.func @transform_5(%arg0: i32) -> (i32, i32, i32) {
    %c0_i32 = arith.constant 0 : i32
    %c0_i32_0 = arith.constant 0 : i32
    %c0_i32_1 = arith.constant 0 : i32
    %c0_i32_2 = arith.constant 0 : i32
    return %c0_i32, %c0_i32_0, %c0_i32_1 : i32, i32, i32
  }
  func.func @transform_6(%arg0: i32) -> (i32, i32, i32) {
    %c0_i32 = arith.constant 0 : i32
    %c0_i32_0 = arith.constant 0 : i32
    %c0_i32_1 = arith.constant 0 : i32
    %c0_i32_2 = arith.constant 0 : i32
    return %c0_i32, %c0_i32_0, %c0_i32_1 : i32, i32, i32
  }
  func.func @transform_7(%arg0: i32) -> (i32, i32, i32) {
    %c0_i32 = arith.constant 0 : i32
    %c0_i32_0 = arith.constant 0 : i32
    %c0_i32_1 = arith.constant 0 : i32
    return %arg0, %c0_i32, %c0_i32_0 : i32, i32, i32
  }
}

</mosaic_0001>

<bundles_post_ra>
// kernel: tpu_custom_call.1
= control target key start
LH: loop header
LB: loop body
LE: loop exit
PB: predicated region body
PF: predicated region fallthrough
CT: control target
= control target key end

     0   :  { %v2400_v3 = vmov 0.0   ;;  %vm128_vm0 = vcmask 261120   ;;  %v98_v39 = vlaneseq  ;;  %vm467_vm1 = vcmask 1043456   ;;  %s3026_s2 = inlined_call_operand.vmem [shape: f32[32,768], index: 2, kind: input, shape index: {}]   ;;  %s3027_s0 = inlined_call_operand.vmem [shape: f32[2,12,32], index: 0, kind: input, shape index: {}]   ;;  %s3028_s3 = inlined_call_operand.vmem [shape: f32[1,768], index: 3, kind: input, shape index: {}]   ;;  %s3029_s1 = inlined_call_operand.vmem [shape: s8[2,12,12], index: 1, kind: input, shape index: {}]   ;;  %s3030_s6 = inlined_call_operand.vmem [shape: f32[2,128,32], index: 6, kind: input, shape index: {}]   ;;  %s3031_s4 = inlined_call_operand.vmem [shape: f32[2,1,128], index: 4, kind: input, shape index: {}]   ;;  %s3032_s5 = inlined_call_operand.vmem [shape: f32[2,1,128], index: 5, kind: input, shape index: {}]   ;;  %s3033_s7 = inlined_call_operand.vmem [shape: f32[2,12,32], index: 7, kind: output, shape index: {}]  }
   0x1   :  { %v27_v0 = vld [vmem:[%s3026_s2 + $0x8] sm:$0xff]  ;;  %v33_v1 = vld [vmem:[%s3026_s2 + $0x38] sm:$0xff]  ;;  %199 = vmatprep.mubr.f32.mxu1 %v2400_v3  ;;  %353 = vmatprep.mubr.f32.mxu0 %v2400_v3  ;;  %v26_v6 = vld [vmem:[%s3026_s2] sm:$0xff]  ;;  %vm2401_vm2 = vmmov 1   ;;  %vm441_vm4 = vcmask 97280   ;;  %vm445_vm5 = vcmask 93184  }
   0x2   :  { %v31_v2 = vld [vmem:[%s3026_s2 + $0x28] sm:$0xff]  ;;  %v2453_v4 = vpack.c.bf16 %v33_v1, %v27_v0  ;;  %v37_v5 = vld [vmem:[%s3026_s2 + $0x58] sm:$0xff]  ;;  %v32_v7 = vld [vmem:[%s3026_s2 + $0x30] sm:$0xff]  ;;  %v99_v40 = vshrl.u32 %v98_v39, 7  ;;  %vm974_vm6 = vcmask 257024  }
   0x3   :  { %v2464_v8 = vpack.c.bf16 %v37_v5, %v31_v2  ;;  %v2466_v9 = vpack.c.bf16 %v32_v7, %v26_v6  ;;  %v30_v10 = vld [vmem:[%s3026_s2 + $0x20] sm:$0xff]  ;;  %v36_v11 = vld [vmem:[%s3026_s2 + $0x50] sm:$0xff]  ;;  %v39_v12 = vld [vmem:[%s3026_s2 + $0x68] sm:$0xff] }
   0x4   :  { %2147 = vmatprep.subr.bf16.mxu1 %v2453_v4  ;;  %v2478_v13 = vpack.c.bf16 %v36_v11, %v30_v10  ;;  %v45_v14 = vld [vmem:[%s3026_s2 + $0x98] sm:$0xff]  ;;  %v43_v15 = vld [vmem:[%s3026_s2 + $0x88] sm:$0xff]  ;;  %v38_v19 = vld [vmem:[%s3026_s2 + $0x60] sm:$0xff]  ;;  %v100_v41 = vsub.s32 0, %v99_v40  ;;  %v116_v43 = vsub.s32 4, %v99_v40  ;;  %v120_v45 = vsub.s32 5, %v99_v40 }
   0x5   :  { %v49_v16 = vld [vmem:[%s3026_s2 + $0xb8] sm:$0xff]  ;;  %2163 = vmatprep.subr.bf16.mxu0 %v2464_v8  ;;  %2149 = vmatpush1.bf16.msra.mxu1 %v2466_v9  ;;  %v2491_v17 = vpack.c.bf16 %v45_v14, %v39_v12  ;;  %v44_v20 = vld [vmem:[%s3026_s2 + $0x90] sm:$0xff]  ;;  %v42_v21 = vld [vmem:[%s3026_s2 + $0x80] sm:$0xff]  ;;  %v104_v46 = vsub.s32 1, %v99_v40  ;;  %v112_v55 = vsub.s32 3, %v99_v40  ;;  %v108_v56 = vsub.s32 2, %v99_v40 }
   0x6   :  { %v2493_v18 = vpack.c.bf16 %v49_v16, %v43_v15  ;;  %2165 = vmatpush1.bf16.msra.mxu0 %v2478_v13  ;;  %v2505_v22 = vpack.c.bf16 %v44_v20, %v38_v19  ;;  %v48_v23 = vld [vmem:[%s3026_s2 + $0xb0] sm:$0xff]  ;;  %v29_v24 = vld [vmem:[%s3026_s2 + $0x18] sm:$0xff]  ;;  %v35_v26 = vld [vmem:[%s3026_s2 + $0x48] sm:$0xff] }
   0x7   :  { %2151 = vmatprep.subr.bf16.mxu1 %v2491_v17  ;;  %v2515_v25 = vpack.c.bf16 %v48_v23, %v42_v21  ;;  %v28_v27 = vld [vmem:[%s3026_s2 + $0x10] sm:$0xff]  ;;  %v34_v28 = vld [vmem:[%s3026_s2 + $0x40] sm:$0xff]  ;;  %v2526_v29 = vpack.c.bf16 %v35_v26, %v29_v24  ;;  %v41_v30 = vld [vmem:[%s3026_s2 + $0x78] sm:$0xff] }
   0x8   :  { %2167 = vmatprep.subr.bf16.mxu0 %v2493_v18  ;;  %v47_v31 = vld [vmem:[%s3026_s2 + $0xa8] sm:$0xff]  ;;  %v87_v32 = vld [vmem:[%s3027_s0] sm:$0xff]  ;;  %v2538_v33 = vpack.c.bf16 %v34_v28, %v28_v27  ;;  %v40_v34 = vld [vmem:[%s3026_s2 + $0x70] sm:$0xff] }
   0x9   :  { %2153 = vmatpush1.bf16.msra.mxu1 %v2505_v22  ;;  %v46_v35 = vld [vmem:[%s3026_s2 + $0xa0] sm:$0xff]  ;;  %v2548_v36 = vpack.c.bf16 %v47_v31, %v41_v30  ;;  %v88_v37 = vld [vmem:[%s3027_s0 + $0x8] sm:$0xf]  ;;  %vm2597_vm3 = vmpackc.low %vm467_vm1, %vm2401_vm2 }
   0xa   :  { %2169 = vmatpush1.bf16.msra.mxu0 %v2515_v25  ;;  %2155 = vmatprep.subr.bf16.mxu1 %v2526_v29  ;;  %v2556_v38 = vpack.c.bf16 %v46_v35, %v40_v34  ;;  %v50_v42 = vld [vmem:[%s3028_s3] sm:$0x3f] }
   0xb   :  { %v2571_v44 = vrot.slane %v50_v42, %v100_v41  ;;  %v2573_v48 = vrot.slane %v50_v42, %v116_v43  ;;  %v2576_v52 = vrot.slane %v50_v42, %v120_v45  ;;  %v2578_v53 = vrot.slane %v50_v42, %v104_v46  ;;  %v2612_v28 = vld [vmem:[%s3029_s1] ss:$4 sps:$2 sm:$0xf]   ;;  %v90_v30 = vld [vmem:[%s3029_s1 + $0x2] sm:$0x1] }
   0xc   :  { %1812 = vmatmul.mubr.msk.f32.vlgmr.msra.gmra.mrb[0].mxu1 %vm128_vm0, %v87_v32  ;;  %v2585_v2 = vrot.slane %v50_v42, %v112_v55  ;;  %v2588_v6 = vrot.slane %v50_v42, %v108_v56  ;;  %v91_v31 = vunpack.c.0.s8 %v2612_v28 }
   0xd   :  { %1816 = vmatmul.mubr.msk.f32.vlgmr.msra.gmra.mrb[0].mxu0 %vm128_vm0, %v87_v32  ;;  %2157 = vmatpush1.bf16.msra.mxu1 %v2538_v33 }
   0xe   :  { %205 = vmatprep.mubr.f32.mxu1 %v2400_v3  ;;  %359 = vmatprep.mubr.f32.mxu0 %v2400_v3  ;;  %v93_v34 = vcvt.s32.f32 %v91_v31 }
   0xf   :  { %2159 = vmatprep.subr.bf16.mxu1 %v2548_v36 }
  0x10   :  { %1813 = vmatmul.mubr.msk.f32.gmra.mrb[2].mxu1 %vm128_vm0, %v88_v37 }
  0x11   :  { %1817 = vmatmul.mubr.msk.f32.gmra.mrb[2].mxu0 %vm128_vm0, %v88_v37  ;;  %2161 = vmatpush1.bf16.msra.mxu1 %v2556_v38 }
  0x12   :  { %276 = vmatprep.mubr.f32.mxu1 %v2400_v3 }
  0x14   :  { %1814 = vmatmul.mubr.msk.f32.vlgmr.msra.gmra.mrb[4].mxu1 %vm128_vm0, %v87_v32  ;;  %v92_v32 = vunpack.c.0.s8 %v90_v30 }
  0x15   :  { %282 = vmatprep.mubr.f32.mxu1 %v2400_v3 }
  0x16   :  { %v94_v35 = vcvt.s32.f32 %v92_v32 }
  0x18   :  { %1815 = vmatmul.mubr.msk.f32.gmra.mrb[6].mxu1 %vm128_vm0, %v88_v37  ;;  %v95_v37 = vmul.f32 -1e+30, %v93_v34  ;;  %v96_v39 = vmul.f32 -1e+30, %v94_v35 }
  0xdf   :  { %v201_v47 = vpop.f32.mrb[0].mxu1 }
  0xe0   :  { %v202_v49 = vadd.f32 %v201_v47, %v2571_v44  ;;  %v203_v50 = vpop.f32.mrb[1].mxu1  ;;  %v355_v51 = vpop.f32.mrb[0].mxu0 }
  0xe1   :  { %v357_v54 = vpop.f32.mrb[1].mxu0  ;;  %v356_v57 = vadd.f32 %v355_v51, %v2573_v48  ;;  %v204_v62 = vadd.f32 %v203_v50, %v2578_v53 }
  0xe2   :  { %1954 = vmatprep.mubr.f32.mxu1 %v202_v49  ;;  %v358_v59 = vadd.f32 %v357_v54, %v2576_v52 }
  0xe3   :  { %v207_v58 = vpop.f32.mrb[2].mxu1 }
  0xe4   :  { %v361_v60 = vpop.f32.mrb[2].mxu0  ;;  %v209_v61 = vpop.f32.mrb[3].mxu1  ;;  %v208_v27 = vadd.f32 %v207_v58, %v2571_v44 }
  0xe5   :  { %v362_v63 = vadd.f32 %v361_v60, %v2573_v48  ;;  %v210_v0 = vadd.f32 %v209_v61, %v2578_v53  ;;  %v363_v1 = vpop.f32.mrb[3].mxu0 }
  0xe6   :  { %v364_v5 = vadd.f32 %v363_v1, %v2576_v52 }
  0xe7   :  { %v2180_v7 = vpack.c.bf16 %v362_v63, %v356_v57  ;;  %v2170_v10 = vpack.c.bf16 %v210_v0, %v204_v62  ;;  %v278_v11 = vpop.f32.mrb[4].mxu1 }
  0xe8   :  { %v2590_v12 = vpack.c.bf16 %v364_v5, %v358_v59  ;;  %v280_v14 = vpop.f32.mrb[5].mxu1  ;;  %v279_v16 = vadd.f32 %v278_v11, %v2588_v6 }
  0xe9   :  { %2181 = vmatprep.subr.bf16.mxu0 %v2180_v7  ;;  %2171 = vmatprep.subr.bf16.mxu1 %v2170_v10  ;;  %v281_v15 = vadd.f32 %v280_v14, %v2585_v2 }
  0xea   :  { %2183 = vmatpush3.bf16.xpose.msra.mxu0 %v2180_v7  ;;  %2173 = vmatpush3.bf16.xpose.msra.mxu1 %v2170_v10 }
  0xeb   :  { %v284_v19 = vpop.f32.mrb[6].mxu1  ;;  %1968 = vmatprep.mubr.f32.mxu0 %v281_v15 }
  0xec   :  { %v285_v20 = vadd.f32 %v284_v19, %v2588_v6  ;;  %v286_v21 = vpop.f32.mrb[7].mxu1 }
  0xed   :  { %v287_v23 = vadd.f32 %v286_v21, %v2585_v2 }
  0xee   :  { %v2174_v26 = vpack.c.bf16 %v285_v20, %v279_v16 }
  0xf0   :  { %2176 = vmatprep.subr.msk.bf16.mxu1 %vm2597_vm3, %v2174_v26 }
  0xf1   :  { %1969 = vmatmul.mubr.f32.vlgmr.msra.gmra.mrb[4].mxu0 %v287_v23  ;;  %1955 = vmatmul.mubr.f32.vlgmr.msra.gmra.mrb[8].mxu1 %v208_v27 }
  0xf2   :  { %2179 = vmatpush3.bf16.msk.msra.mxu1 %vm2597_vm3, %v2174_v26 }
  0xf3   :  { %2186 = vmatprep.subr.msk.bf16.mxu1 %vm2597_vm3, %v2590_v12 }
 0x1c4   :  { %v1970_v40 = vpop.f32.mrb[4].mxu0  ;;  %v1956_v41 = vpop.f32.mrb[8].mxu1 }
 0x1c5   :  { %v662_v42 = vpop.f32.mrb[5].mxu0  ;;  %v432_v43 = vpop.f32.mrb[9].mxu1  ;;  %v668_v45 = vadd.f32 %v1970_v40, %v96_v39  ;;  %v438_v49 = vadd.f32 %v1956_v41, %v96_v39  ;;  %v1831_v41 = vld [vmem:[%s3029_s1 + $0x6] sm:$0x1] }
 0x1c6   :  { %v663_v46 = vadd.f32 %v662_v42, %v95_v37  ;;  %v433_v47 = vadd.f32 %v432_v43, %v95_v37  ;;  %v983_v42 = vunpack.c.0.s8 %v1831_v41  ;;  %v982_v43 = vunpack.c.1.s8 %v2612_v28  ;;  %v80_v41 = vld [vmem:[%s3030_s6 + $0xc8] sm:$0xff] }
 0x1c7   :  { %v674_v54 = vsel %vm445_vm5, %v668_v45, -inf  ;;  %v446_v55 = vsel %vm445_vm5, %v438_v49, -inf }
 0x1c8   :  { %v671_v50 = vsel %vm441_vm4, %v663_v46, -inf  ;;  %v442_v51 = vsel %vm441_vm4, %v433_v47, -inf }
 0x1c9   :  { %672 = vmax.xlane.f32.xlu1 %v671_v50  ;;  %443 = vmax.xlane.f32.xlu0 %v442_v51 }
 0x1cd   :  { %675 = vmax.xlane.f32.xlu1 %v674_v54  ;;  %447 = vmax.xlane.f32.xlu0 %v446_v55 }
 0x256   :  { %v673_v56 = vpop.xlane.xlu1 %672  ;;  %v444_v57 = vpop.xlane.xlu0 %443 }
 0x257   :  { %v449_v58 = vsub.f32 %v433_v47, %v444_v57  ;;  %v677_v59 = vsub.f32 %v663_v46, %v673_v56  ;;  %v984_v46 = vcvt.s32.f32 %v982_v43 }
 0x259   :  { %v451_v60 = vmul.f32 1.442695, %v449_v58  ;;  %v679_v1 = vmul.f32 1.442695, %v677_v59 }
 0x25a   :  { %v676_v61 = vpop.xlane.xlu1 %675  ;;  %v448_v62 = vpop.xlane.xlu0 %447 }
 0x25b   :  { %v450_v63 = vsub.f32 %v438_v49, %v448_v62  ;;  %2368 = vpow2.f32 %v451_v60  ;;  %v678_v0 = vsub.f32 %v668_v45, %v676_v61  ;;  %v985_v45 = vcvt.s32.f32 %v983_v42 }
 0x25c   :  { %v986_v49 = vmul.f32 -1e+30, %v984_v46  ;;  %v82_v46 = vld [vmem:[%s3030_s6 + $0xd8] sm:$0xff] }
 0x25d   :  { %v453_v5 = vmul.f32 1.442695, %v450_v63  ;;  %v681_v7 = vmul.f32 1.442695, %v678_v0  ;;  %v987_v47 = vmul.f32 -1e+30, %v985_v45 }
 0x25e   :  { %v81_v45 = vld [vmem:[%s3030_s6 + $0xd0] sm:$0xff] }
 0x25f   :  { %2370 = vpow2.f32 %v453_v5 }
 0x260   :  { %2372 = vpow2.f32 %v679_v1 }
 0x261   :  { %2374 = vpow2.f32 %v681_v7 }
 0x265   :  { %v2622_v10 = vpop.eup %2368 }
 0x266   :  { %1961 = vmatprep.mubr.msk.f32.mxu1 %vm441_vm4, %v2622_v10 }
 0x269   :  { %v2626_v11 = vpop.eup %2370 }
 0x26a   :  { %v2628_v14 = vpop.eup %2372  ;;  %1962 = vmatmul.mubr.msk.f32.vlgmr.msra.gmra.mrb[10].mxu1 %vm441_vm4, %v2626_v11 }
 0x26b   :  { %2189 = vmatpush3.bf16.msk.msra.mxu1 %vm2597_vm3, %v2590_v12  ;;  %1975 = vmatprep.mubr.msk.f32.mxu1 %vm441_vm4, %v2628_v14  ;;  %v2638_v15 = vpop.eup %2374  ;;  %v1828_v12 = vld [vmem:[%s3027_s0 + $0x10] sm:$0xff] }
 0x26c   :  { %2255 = vmatprep.subr.bf16.mxu1 %v2453_v4  ;;  %v1829_v4 = vld [vmem:[%s3027_s0 + $0x18] sm:$0xf] }
 0x26e   :  { %1976 = vmatmul.mubr.msk.f32.vlgmr.msra.gmra.mrb[12].mxu1 %vm441_vm4, %v2638_v15 }
 0x26f   :  { %2257 = vmatpush1.bf16.msra.mxu1 %v2466_v9  ;;  %1058 = vmatprep.mubr.f32.mxu1 %v2400_v3 }
 0x270   :  { %2259 = vmatprep.subr.bf16.mxu1 %v2491_v17 }
 0x273   :  { %2261 = vmatpush1.bf16.msra.mxu1 %v2505_v22 }
 0x274   :  { %2263 = vmatprep.subr.bf16.mxu1 %v2526_v29 }
 0x276   :  { %1832 = vmatmul.mubr.msk.f32.vlgmr.msra.gmra.mrb[14].mxu1 %vm128_vm0, %v1828_v12 }
 0x277   :  { %1064 = vmatprep.mubr.f32.mxu1 %v2400_v3  ;;  %2265 = vmatpush1.bf16.msra.mxu1 %v2538_v33 }
 0x278   :  { %2267 = vmatprep.subr.bf16.mxu1 %v2548_v36 }
 0x27a   :  { %1833 = vmatmul.mubr.msk.f32.gmra.mrb[16].mxu1 %vm128_vm0, %v1829_v4 }
 0x27b   :  { %2269 = vmatpush1.bf16.msra.mxu1 %v2556_v38  ;;  %1135 = vmatprep.mubr.f32.mxu1 %v2400_v3 }
 0x27c   :  { %2271 = vmatprep.subr.bf16.mxu1 %v2464_v8 }
 0x27e   :  { %1834 = vmatmul.mubr.msk.f32.vlgmr.msra.gmra.mrb[18].mxu1 %vm128_vm0, %v1828_v12 }
 0x27f   :  { %2273 = vmatpush1.bf16.msra.mxu1 %v2478_v13  ;;  %1141 = vmatprep.mubr.f32.mxu1 %v2400_v3 }
 0x280   :  { %2275 = vmatprep.subr.bf16.mxu1 %v2493_v18 }
 0x282   :  { %1835 = vmatmul.mubr.msk.f32.gmra.mrb[20].mxu1 %vm128_vm0, %v1829_v4 }
 0x283   :  { %2277 = vmatpush1.bf16.msra.mxu1 %v2515_v25  ;;  %1212 = vmatprep.mubr.f32.mxu1 %v2400_v3 }
 0x286   :  { %1836 = vmatmul.mubr.msk.f32.vlgmr.msra.gmra.mrb[22].mxu1 %vm128_vm0, %v1828_v12 }
 0x287   :  { %1218 = vmatprep.mubr.f32.mxu1 %v2400_v3 }
 0x28a   :  { %1837 = vmatmul.mubr.msk.f32.gmra.mrb[24].mxu1 %vm128_vm0, %v1829_v4 }
 0x33d   :  { %v2671_v8 = vpop.f32.mrb[10].mxu1 }
 0x33e   :  { %v2673_v9 = vpop.f32.mrb[11].mxu1 }
 0x341   :  { %v2675_v13 = vpop.f32.mrb[12].mxu1 }
 0x342   :  { %v2677_v17 = vpop.f32.mrb[13].mxu1  ;;  %v775_v24 = vsel %vm467_vm1, %v2675_v13, 0.0 }
 0x349   :  { %v1060_v18 = vpop.f32.mrb[14].mxu1 }
 0x34a   :  { %v1061_v22 = vadd.f32 %v1060_v18, %v2571_v44  ;;  %v1062_v25 = vpop.f32.mrb[15].mxu1 }
 0x34b   :  { %v1063_v36 = vadd.f32 %v1062_v25, %v2578_v53  ;;  %v780_v25 = vmul.f32 %v2677_v17, %v2677_v17 }
 0x34c   :  { %2052 = vmatprep.mubr.f32.mxu1 %v1061_v22 }
 0x34d   :  { %v1066_v29 = vpop.f32.mrb[16].mxu1 }
 0x34e   :  { %v1068_v33 = vpop.f32.mrb[17].mxu1  ;;  %v1067_v30 = vadd.f32 %v1066_v29, %v2571_v44  ;;  %v781_v29 = vmul.f32 %v2675_v13, %v2675_v13 }
 0x34f   :  { %v1069_v3 = vadd.f32 %v1068_v33, %v2578_v53  ;;  %v683_v33 = vsel %vm441_vm4, %v2628_v14, 0.0  ;;  %v72_v14 = vld [vmem:[%s3030_s6 + $0x88] sm:$0xff] }
 0x351   :  { %v2278_v38 = vpack.c.bf16 %v1069_v3, %v1063_v36  ;;  %v1137_v16 = vpop.f32.mrb[18].mxu1  ;;  %v784_v36 = vsel %vm467_vm1, %v781_v29, 0.0  ;;  %v686_v3 = vsel %vm445_vm5, %v2638_v15, 0.0  ;;  %v553_v15 = vmul.f32 %v2673_v9, %v2673_v9 }
 0x352   :  { %v1139_v19 = vpop.f32.mrb[19].mxu1  ;;  %v1138_v20 = vadd.f32 %v1137_v16, %v2588_v6  ;;  %v71_v16 = vld [vmem:[%s3030_s6 + $0x80] sm:$0xff] }
 0x353   :  { %2279 = vmatprep.subr.bf16.mxu1 %v2278_v38  ;;  %v1140_v63 = vadd.f32 %v1139_v19, %v2585_v2  ;;  %v2746_v19 = vpack.c.bf16 %v72_v14, %v71_v16  ;;  %v57_v14 = vld [vmem:[%s3030_s6 + $0x10] sm:$0xff] }
 0x354   :  { %2281 = vmatpush3.bf16.xpose.msra.mxu1 %v2278_v38  ;;  %v548_v38 = vsel %vm467_vm1, %v2671_v8, 0.0 }
 0x355   :  { %v1143_v21 = vpop.f32.mrb[20].mxu1  ;;  %2191 = vmatprep.subr.bf16.mxu0 %v2746_v19 }
 0x356   :  { %v1144_v23 = vadd.f32 %v1143_v21, %v2588_v6  ;;  %v1145_v26 = vpop.f32.mrb[21].mxu1  ;;  %v455_v21 = vsel %vm441_vm4, %v2622_v10, 0.0  ;;  %2193 = vmatpush3.bf16.msra.mxu0 %v2746_v19  ;;  %v458_v10 = vsel %vm445_vm5, %v2626_v11, 0.0  ;;  %v77_v11 = vld [vmem:[%s3030_s6 + $0xb0] sm:$0xff] }
 0x357   :  { %v1146_v0 = vadd.f32 %v1145_v26, %v2585_v2  ;;  %v74_v26 = vld [vmem:[%s3030_s6 + $0x98] sm:$0xff] }
 0x358   :  { %v2282_v27 = vpack.c.bf16 %v1144_v23, %v1138_v20  ;;  %v554_v20 = vmul.f32 %v2671_v8, %v2671_v8  ;;  %v73_v23 = vld [vmem:[%s3030_s6 + $0x90] sm:$0xff] }
 0x359   :  { %v1214_v31 = vpop.f32.mrb[22].mxu1 }
 0x35a   :  { %2284 = vmatprep.subr.msk.bf16.mxu1 %vm2597_vm3, %v2282_v27  ;;  %v1216_v32 = vpop.f32.mrb[23].mxu1  ;;  %v1215_v53 = vadd.f32 %v1214_v31, %v2573_v48  ;;  %v75_v31 = vld [vmem:[%s3030_s6 + $0xa0] sm:$0xff] }
 0x35b   :  { %2053 = vmatmul.mubr.f32.vlgmr.msra.gmra.mrb[26].mxu1 %v1067_v30  ;;  %v1217_v34 = vadd.f32 %v1216_v32, %v2576_v52  ;;  %v557_v30 = vsel %vm467_vm1, %v554_v20, 0.0  ;;  %v76_v32 = vld [vmem:[%s3030_s6 + $0xa8] sm:$0xff] }
 0x35c   :  { %2287 = vmatpush3.bf16.msk.msra.mxu1 %vm2597_vm3, %v2282_v27  ;;  %v2762_v27 = vpack.c.bf16 %v74_v26, %v73_v23 }
 0x35d   :  { %v1220_v35 = vpop.f32.mrb[24].mxu1 }
 0x35e   :  { %v1221_v6 = vadd.f32 %v1220_v35, %v2573_v48  ;;  %v1222_v37 = vpop.f32.mrb[25].mxu1  ;;  %2195 = vmatprep.subr.bf16.mxu0 %v2762_v27 }
 0x35f   :  { %v1223_v39 = vadd.f32 %v1222_v37, %v2576_v52  ;;  %2197 = vmatpush3.bf16.msra.mxu0 %v2762_v27 }
 0x360   :  { %v2288_v44 = vpack.c.bf16 %v1221_v6, %v1215_v53  ;;  %v2775_v53 = vpack.c.bf16 %v76_v32, %v75_v31  ;;  %v78_v6 = vld [vmem:[%s3030_s6 + $0xb8] sm:$0xff] }
 0x361   :  { %v2292_v40 = vpack.c.bf16 %v1223_v39, %v1217_v34  ;;  %v2790_v37 = vpack.c.bf16 %v78_v6, %v77_v11  ;;  %v59_v11 = vld [vmem:[%s3030_s6 + $0x20] sm:$0xff]  ;;  %v60_v6 = vld [vmem:[%s3030_s6 + $0x28] sm:$0xff] }
 0x362   :  { %2289 = vmatprep.subr.bf16.mxu1 %v2288_v44  ;;  %2199 = vmatprep.subr.bf16.mxu0 %v2775_v53 }
 0x363   :  { %2201 = vmatpush3.bf16.msra.mxu0 %v2775_v53 }
 0x364   :  { %2203 = vmatprep.subr.bf16.mxu0 %v2790_v37 }
 0x367   :  { %2205 = vmatpush3.bf16.msra.mxu0 %v2790_v37 }
 0x42e   :  { %v2054_v50 = vpop.f32.mrb[26].mxu1 }
 0x42f   :  { %v1297_v51 = vadd.f32 %v2054_v50, %v987_v47  ;;  %v1291_v48 = vpop.f32.mrb[27].mxu1  ;;  %v83_v50 = vld [vmem:[%s3030_s6 + $0xe0] sm:$0xff] }
 0x430   :  { %v1292_v54 = vadd.f32 %v1291_v48, %v986_v49 }
 0x431   :  { %v1303_v52 = vsel %vm445_vm5, %v1297_v51, -inf }
 0x432   :  { %1304 = vmax.xlane.f32.xlu1 %v1303_v52  ;;  %v1300_v55 = vsel %vm441_vm4, %v1292_v54, -inf  ;;  %v86_v52 = vld [vmem:[%s3030_s6 + $0xf8] sm:$0xff] }
 0x433   :  { %1301 = vmax.xlane.f32.xlu0 %v1300_v55 }
 0x4bf   :  { %v1305_v56 = vpop.xlane.xlu1 %1304 }
 0x4c0   :  { %v1307_v57 = vsub.f32 %v1297_v51, %v1305_v56  ;;  %v1302_v58 = vpop.xlane.xlu0 %1301  ;;  %v84_v51 = vld [vmem:[%s3030_s6 + $0xe8] sm:$0xff]  ;;  %v55_v56 = vld [vmem:[%s3030_s6] sm:$0xff] }
 0x4c1   :  { %v1306_v59 = vsub.f32 %v1292_v54, %v1302_v58  ;;  %v2827_v48 = vpack.c.bf16 %v84_v51, %v83_v50  ;;  %v85_v54 = vld [vmem:[%s3030_s6 + $0xf0] sm:$0xff]  ;;  %v62_v51 = vld [vmem:[%s3030_s6 + $0x38] sm:$0xff] }
 0x4c2   :  { %v1310_v60 = vmul.f32 1.442695, %v1307_v57  ;;  %v2837_v55 = vpack.c.bf16 %v86_v52, %v85_v54  ;;  %v56_v57 = vld [vmem:[%s3030_s6 + $0x8] sm:$0xff]  ;;  %v61_v50 = vld [vmem:[%s3030_s6 + $0x30] sm:$0xff] }
 0x4c3   :  { %v1308_v28 = vmul.f32 1.442695, %v1306_v59  ;;  %v2845_v58 = vpack.c.bf16 %v56_v57, %v55_v56  ;;  %v2895_v57 = vpack.c.bf16 %v62_v51, %v61_v50 }
 0x4c5   :  { %2376 = vpow2.f32 %v1308_v28 }
 0x4c6   :  { %2378 = vpow2.f32 %v1310_v60 }
 0x4cf   :  { %v2699_v61 = vpop.eup %2376 }
 0x4d0   :  { %v2701_v62 = vpop.eup %2378  ;;  %2059 = vmatprep.mubr.msk.f32.mxu1 %vm441_vm4, %v2699_v61  ;;  %v1312_v43 = vsel %vm441_vm4, %v2699_v61, 0.0 }
 0x4d1   :  { %2060 = vmatmul.mubr.msk.f32.vlgmr.msra.gmra.mrb[28].mxu1 %vm441_vm4, %v2701_v62 }
 0x4d2   :  { %2291 = vmatpush3.bf16.xpose.msra.mxu1 %v2288_v44  ;;  %2066 = vmatprep.mubr.f32.mxu1 %v1140_v63 }
 0x4d3   :  { %2294 = vmatprep.subr.msk.bf16.mxu1 %vm2597_vm3, %v2292_v40 }
 0x4d9   :  { %2067 = vmatmul.mubr.f32.vlgmr.msra.gmra.mrb[30].mxu1 %v1146_v0 }
 0x4da   :  { %2297 = vmatpush3.bf16.msk.msra.mxu1 %vm2597_vm3, %v2292_v40  ;;  %v79_v40 = vld [vmem:[%s3030_s6 + $0xc0] sm:$0xff] }
 0x4db   :  { %v2803_v42 = vpack.c.bf16 %v80_v41, %v79_v40  ;;  %2331 = vmatprep.subr.bf16.mxu1 %v2845_v58 }
 0x4dd   :  { %2207 = vmatprep.subr.bf16.mxu0 %v2803_v42 }
 0x4de   :  { %2209 = vmatpush3.bf16.msra.mxu0 %v2803_v42 }
 0x5a4   :  { %v2713_v1 = vpop.f32.mrb[28].mxu1 }
 0x5a5   :  { %v2715_v5 = vpop.f32.mrb[29].mxu1  ;;  %v1410_v35 = vmul.f32 %v2713_v1, %v2713_v1  ;;  %v1404_v44 = vsel %vm467_vm1, %v2713_v1, 0.0 }
 0x5a6   :  { %v1409_v34 = vmul.f32 %v2715_v5, %v2715_v5 }
 0x5a7   :  { %v1413_v39 = vsel %vm467_vm1, %v1410_v35, 0.0 }
 0x5ac   :  { %v2068_v7 = vpop.f32.mrb[30].mxu1 }
 0x5ad   :  { %v2717_v12 = vadd.f32 %v2068_v7, %v987_v47  ;;  %v1506_v4 = vpop.f32.mrb[31].mxu1  ;;  %v2815_v47 = vpack.c.bf16 %v82_v46, %v81_v45 }
 0x5ae   :  { %v2719_v18 = vadd.f32 %v1506_v4, %v986_v49  ;;  %v1315_v49 = vsel %vm445_vm5, %v2701_v62, 0.0 }
 0x5af   :  { %v1518_v22 = vsel %vm445_vm5, %v2717_v12, -inf  ;;  %2211 = vmatprep.subr.bf16.mxu0 %v2815_v47 }
 0x5b0   :  { %1519 = vmax.xlane.f32.xlu1 %v1518_v22  ;;  %v1515_v2 = vsel %vm441_vm4, %v2719_v18, -inf  ;;  %2213 = vmatpush3.bf16.msra.mxu0 %v2815_v47 }
 0x5b1   :  { %1516 = vmax.xlane.f32.xlu0 %v1515_v2  ;;  %2215 = vmatprep.subr.bf16.mxu0 %v2827_v48 }
 0x5b4   :  { %776 = vadd.xlane.f32.xlu1 %v775_v24  ;;  %2217 = vmatpush3.bf16.msra.mxu0 %v2827_v48 }
 0x5b5   :  { %773 = vadd.xlane.f32.xlu0 %v2677_v17  ;;  %2219 = vmatprep.subr.bf16.mxu0 %v2837_v55 }
 0x5b8   :  { %782 = vadd.xlane.f32.xlu1 %v780_v25  ;;  %2221 = vmatpush3.bf16.msra.mxu0 %v2837_v55 }
 0x5b9   :  { %684 = vadd.xlane.f32.xlu0 %v683_v33  ;;  %2223 = vmatprep.subr.bf16.mxu0 %v2845_v58 }
 0x5bc   :  { %785 = vadd.xlane.f32.xlu1 %v784_v36 }
 0x5bd   :  { %687 = vadd.xlane.f32.xlu0 %v686_v3 }
 0x5c0   :  { %549 = vadd.xlane.f32.xlu1 %v548_v38 }
 0x5c1   :  { %546 = vadd.xlane.f32.xlu0 %v2673_v9 }
 0x5c4   :  { %555 = vadd.xlane.f32.xlu1 %v553_v15  ;;  %v58_v15 = vld [vmem:[%s3030_s6 + $0x18] sm:$0xff] }
 0x5c5   :  { %456 = vadd.xlane.f32.xlu0 %v455_v21  ;;  %v2867_v31 = vpack.c.bf16 %v58_v15, %v57_v14 }
 0x5c8   :  { %558 = vadd.xlane.f32.xlu1 %v557_v30 }
 0x5c9   :  { %459 = vadd.xlane.f32.xlu0 %v458_v10 }
 0x5cc   :  { %1411 = vadd.xlane.f32.xlu1 %v1409_v34 }
 0x5cd   :  { %1402 = vadd.xlane.f32.xlu0 %v2715_v5 }
 0x5d0   :  { %1414 = vadd.xlane.f32.xlu1 %v1413_v39 }
 0x5d1   :  { %1405 = vadd.xlane.f32.xlu0 %v1404_v44 }
 0x5d5   :  { %1313 = vadd.xlane.f32.xlu0 %v1312_v43  ;;  %v2884_v43 = vpack.c.bf16 %v60_v6, %v59_v11 }
 0x5d9   :  { %1316 = vadd.xlane.f32.xlu0 %v1315_v49 }
 0x63d   :  { %v1520_v59 = vpop.xlane.xlu1 %1519 }
 0x63e   :  { %v1522_v60 = vsub.f32 %v2717_v12, %v1520_v59  ;;  %v1517_v28 = vpop.xlane.xlu0 %1516 }
 0x63f   :  { %v1521_v61 = vsub.f32 %v2719_v18, %v1517_v28  ;;  %v63_v28 = vld [vmem:[%s3030_s6 + $0x40] sm:$0xff] }
 0x640   :  { %v1525_v62 = vmul.f32 1.442695, %v1522_v60 }
 0x641   :  { %v1523_v63 = vmul.f32 1.442695, %v1521_v61  ;;  %v777_v0 = vpop.xlane.xlu1 %776  ;;  %v64_v61 = vld [vmem:[%s3030_s6 + $0x48] sm:$0xff] }
 0x642   :  { %v774_v7 = vpop.xlane.xlu0 %773  ;;  %v2857_v24 = vmul.f32 0.0625, %v777_v0  ;;  %v2908_v0 = vld [vmem:[%s3031_s4 + $0x1] ss:$0 sm:$0xff] }
 0x643   :  { %2380 = vpow2.f32 %v1523_v63  ;;  %v2853_v4 = vmul.f32 0.0625, %v774_v7 }
 0x644   :  { %2382 = vpow2.f32 %v1525_v62  ;;  %v790_v3 = vmul.f32 %v2857_v24, %v2857_v24 }
 0x645   :  { %v789_v22 = vmul.f32 %v2853_v4, %v2853_v4  ;;  %v783_v2 = vpop.xlane.xlu1 %782  ;;  %v793_v59 = vsub.f32 %v2677_v17, %v2853_v4  ;;  %v2914_v17 = vld [vmem:[%s3032_s5 + $0x1] ss:$0 sm:$0xff]  ;;  %v2917_v4 = vpack.c.bf16 %v64_v61, %v63_v28 }
 0x646   :  { %v787_v25 = vmul.f32 0.0625, %v783_v2  ;;  %v685_v29 = vpop.xlane.xlu0 %684  ;;  %v794_v2 = vsub.f32 %v2675_v13, %v2857_v24 }
 0x647   :  { %v795_v12 = vmul.f32 1e-05, %v685_v29 }
 0x648   :  { %v791_v33 = vsub.f32 %v787_v25, %v789_v22 }
 0x649   :  { %v797_v36 = vmul.f32 %v795_v12, %v685_v29  ;;  %v786_v18 = vpop.xlane.xlu1 %785 }
 0x64a   :  { %v788_v38 = vmul.f32 0.0625, %v786_v18  ;;  %v688_v16 = vpop.xlane.xlu0 %687 }
 0x64b   :  { %v799_v20 = vadd.f32 %v797_v36, %v791_v33  ;;  %v796_v21 = vmul.f32 1e-05, %v688_v16  ;;  %v65_v33 = vld [vmem:[%s3030_s6 + $0x50] sm:$0xff]  ;;  %v66_v36 = vld [vmem:[%s3030_s6 + $0x58] sm:$0xff] }
 0x64c   :  { %v792_v23 = vsub.f32 %v788_v38, %v790_v3  ;;  %v2935_v24 = vpack.c.bf16 %v66_v36, %v65_v33 }
 0x64d   :  { %v2381_v26 = vpop.eup %2380  ;;  %2384 = vrsqrt.f32 %v799_v20  ;;  %v798_v30 = vmul.f32 %v796_v21, %v688_v16  ;;  %v550_v10 = vpop.xlane.xlu1 %549 }
 0x64e   :  { %v2383_v32 = vpop.eup %2382  ;;  %2073 = vmatprep.mubr.msk.f32.mxu1 %vm441_vm4, %v2381_v26  ;;  %v547_v34 = vpop.xlane.xlu0 %546  ;;  %v1527_v35 = vsel %vm441_vm4, %v2381_v26, 0.0  ;;  %v2921_v25 = vmul.f32 0.0625, %v550_v10  ;;  %v68_v10 = vld [vmem:[%s3030_s6 + $0x68] sm:$0xff] }
 0x64f   :  { %v800_v39 = vadd.f32 %v798_v30, %v792_v23  ;;  %v2877_v44 = vmul.f32 0.0625, %v547_v34  ;;  %2074 = vmatmul.mubr.msk.f32.vlgmr.msra.gmra.mrb[32].mxu1 %vm441_vm4, %v2383_v32  ;;  %1528 = vadd.xlane.f32.xlu0 %v1527_v35  ;;  %v1530_v49 = vsel %vm445_vm5, %v2383_v32, 0.0  ;;  %v67_v30 = vld [vmem:[%s3030_s6 + $0x60] sm:$0xff] }
 0x650   :  { %2333 = vmatpush3.bf16.msra.mxu1 %v2845_v58  ;;  %v563_v15 = vmul.f32 %v2921_v25, %v2921_v25 }
 0x651   :  { %2386 = vrsqrt.f32 %v800_v39  ;;  %v562_v40 = vmul.f32 %v2877_v44, %v2877_v44  ;;  %v556_v41 = vpop.xlane.xlu1 %555  ;;  %2335 = vmatprep.subr.bf16.mxu1 %v2867_v31  ;;  %v2951_v39 = vpack.c.bf16 %v68_v10, %v67_v30 }
 0x652   :  { %v560_v45 = vmul.f32 0.0625, %v556_v41  ;;  %v457_v46 = vpop.xlane.xlu0 %456  ;;  %v70_v41 = vld [vmem:[%s3030_s6 + $0x78] sm:$0xff] }
 0x653   :  { %v568_v54 = vmul.f32 1e-05, %v457_v46  ;;  %1531 = vadd.xlane.f32.xlu0 %v1530_v49 }
 0x654   :  { %v564_v52 = vsub.f32 %v560_v45, %v562_v40  ;;  %2337 = vmatpush3.bf16.msra.mxu1 %v2867_v31  ;;  %v69_v40 = vld [vmem:[%s3030_s6 + $0x70] sm:$0xff]  ;;  %v566_v45 = vsub.f32 %v2673_v9, %v2877_v44  ;;  %v1822_v9 = vld [vmem:[%s3032_s5] ss:$0 sm:$0xff] }
 0x655   :  { %v570_v56 = vmul.f32 %v568_v54, %v457_v46  ;;  %2339 = vmatprep.subr.bf16.mxu1 %v2884_v43  ;;  %v559_v7 = vpop.xlane.xlu1 %558  ;;  %v2250_v28 = vpack.c.bf16 %v70_v41, %v69_v40 }
 0x656   :  { %v460_v60 = vpop.xlane.xlu0 %459  ;;  %v561_v3 = vmul.f32 0.0625, %v559_v7 }
 0x657   :  { %v2385_v62 = vpop.eup %2384  ;;  %v572_v63 = vadd.f32 %v570_v56, %v564_v52  ;;  %v569_v38 = vmul.f32 1e-05, %v460_v60  ;;  %v1821_v52 = vld [vmem:[%s3031_s4] ss:$0 sm:$0xff] }
 0x658   :  { %v803_v22 = vmul.f32 %v2385_v62, %v793_v59  ;;  %2341 = vmatpush3.bf16.msra.mxu1 %v2884_v43  ;;  %v565_v32 = vsub.f32 %v561_v3, %v563_v15 }
 0x659   :  { %2388 = vrsqrt.f32 %v572_v63  ;;  %2343 = vmatprep.subr.bf16.mxu1 %v2895_v57  ;;  %v1412_v20 = vpop.xlane.xlu1 %1411  ;;  %v571_v34 = vmul.f32 %v569_v38, %v460_v60 }
 0x65a   :  { %v1403_v29 = vpop.xlane.xlu0 %1402  ;;  %v811_v12 = vmul.f32 %v2908_v0, %v803_v22  ;;  %v1416_v51 = vmul.f32 0.0625, %v1412_v20 }
 0x65b   :  { %v2387_v18 = vpop.eup %2386  ;;  %v2932_v13 = vmul.f32 0.0625, %v1403_v29  ;;  %v573_v56 = vadd.f32 %v571_v34, %v565_v32 }
 0x65c   :  { %v819_v16 = vadd.f32 %v2914_v17, %v811_v12  ;;  %v804_v14 = vmul.f32 %v2387_v18, %v794_v2  ;;  %2345 = vmatpush3.bf16.msra.mxu1 %v2895_v57 }
 0x65d   :  { %2347 = vmatprep.subr.bf16.mxu1 %v2917_v4  ;;  %v1418_v11 = vmul.f32 %v2932_v13, %v2932_v13  ;;  %v1415_v59 = vpop.xlane.xlu1 %1414  ;;  %2390 = vrsqrt.f32 %v573_v56  ;;  %v1422_v38 = vsub.f32 %v2715_v5, %v2932_v13 }
 0x65e   :  { %v1406_v21 = vpop.xlane.xlu0 %1405  ;;  %v821_v23 = vmax.f32 %v819_v16, 0.0  ;;  %v812_v26 = vmul.f32 %v2908_v0, %v804_v14  ;;  %v1417_v22 = vmul.f32 0.0625, %v1415_v59  ;;  %v567_v16 = vsub.f32 %v2671_v8, %v2921_v25 }
 0x65f   :  { %v1408_v6 = vmul.f32 0.0625, %v1406_v21  ;;  %v1420_v61 = vsub.f32 %v1416_v51, %v1418_v11 }
 0x660   :  { %2010 = vmatprep.mubr.f32.mxu0 %v821_v23  ;;  %v820_v35 = vadd.f32 %v2914_v17, %v812_v26  ;;  %2349 = vmatpush3.bf16.msra.mxu1 %v2917_v4 }
 0x661   :  { %2351 = vmatprep.subr.bf16.mxu1 %v2935_v24  ;;  %v1419_v62 = vmul.f32 %v1408_v6, %v1408_v6  ;;  %v1423_v15 = vsub.f32 %v2713_v1, %v1408_v6 }
 0x662   :  { %v1314_v46 = vpop.xlane.xlu0 %1313  ;;  %v822_v49 = vmax.f32 %v820_v35, 0.0 }
 0x663   :  { %v2389_v50 = vpop.eup %2388  ;;  %v1424_v54 = vmul.f32 1e-05, %v1314_v46  ;;  %v1421_v33 = vsub.f32 %v1417_v22, %v1419_v62 }
 0x664   :  { %2011 = vmatmul.mubr.f32.vlgmr.msra.gmra.mrb[6].mxu0 %v822_v49  ;;  %v576_v60 = vmul.f32 %v2389_v50, %v566_v45  ;;  %2353 = vmatpush3.bf16.msra.mxu1 %v2935_v24 }
 0x665   :  { %v1426_v63 = vmul.f32 %v1424_v54, %v1314_v46  ;;  %2225 = vmatpush3.bf16.msra.mxu0 %v2845_v58  ;;  %2355 = vmatprep.subr.bf16.mxu1 %v2951_v39 }
 0x666   :  { %v1317_v44 = vpop.xlane.xlu0 %1316  ;;  %2227 = vmatprep.subr.bf16.mxu0 %v2867_v31  ;;  %v584_v7 = vmul.f32 %v1821_v52, %v576_v60 }
 0x667   :  { %v1428_v2 = vadd.f32 %v1426_v63, %v1420_v61  ;;  %v1425_v29 = vmul.f32 1e-05, %v1317_v44  ;;  %v2391_v3 = vpop.eup %2390 }
 0x668   :  { %v592_v12 = vadd.f32 %v1822_v9, %v584_v7  ;;  %2357 = vmatpush3.bf16.msra.mxu1 %v2951_v39  ;;  %v577_v20 = vmul.f32 %v2391_v3, %v567_v16 }
 0x669   :  { %2392 = vrsqrt.f32 %v1428_v2  ;;  %v1427_v58 = vmul.f32 %v1425_v29, %v1317_v44  ;;  %2229 = vmatpush3.bf16.msra.mxu0 %v2867_v31  ;;  %2359 = vmatprep.subr.bf16.mxu1 %v2250_v28 }
 0x66a   :  { %2231 = vmatprep.subr.bf16.mxu0 %v2884_v43  ;;  %v594_v36 = vmax.f32 %v592_v12, 0.0  ;;  %v585_v26 = vmul.f32 %v1821_v52, %v577_v20 }
 0x66b   :  { %v1429_v18 = vadd.f32 %v1427_v58, %v1421_v33 }
 0x66c   :  { %2045 = vmatprep.mubr.f32.mxu0 %v594_v36  ;;  %2361 = vmatpush3.bf16.msra.mxu1 %v2250_v28 }
 0x66d   :  { %2394 = vrsqrt.f32 %v1429_v18  ;;  %2233 = vmatpush3.bf16.msra.mxu0 %v2884_v43 }
 0x66e   :  { %2235 = vmatprep.subr.bf16.mxu0 %v2895_v57 }
 0x671   :  { %2237 = vmatpush3.bf16.msra.mxu0 %v2895_v57 }
 0x672   :  { %2239 = vmatprep.subr.bf16.mxu0 %v2917_v4 }
 0x673   :  { %v2393_v31 = vpop.eup %2392 }
 0x674   :  { %v1432_v14 = vmul.f32 %v2393_v31, %v1422_v38 }
 0x675   :  { %2241 = vmatpush3.bf16.msra.mxu0 %v2917_v4  ;;  %v593_v4 = vadd.f32 %v1822_v9, %v585_v26 }
 0x676   :  { %2243 = vmatprep.subr.bf16.mxu0 %v2935_v24  ;;  %v1434_v43 = vmul.f32 %v1821_v52, %v1432_v14 }
 0x677   :  { %v2395_v57 = vpop.eup %2394  ;;  %v595_v25 = vmax.f32 %v593_v4, 0.0 }
 0x678   :  { %v1436_v21 = vadd.f32 %v1822_v9, %v1434_v43  ;;  %v1433_v23 = vmul.f32 %v2395_v57, %v1423_v15 }
 0x679   :  { %2245 = vmatpush3.bf16.msra.mxu0 %v2935_v24 }
 0x67a   :  { %2247 = vmatprep.subr.bf16.mxu0 %v2951_v39  ;;  %v1438_v5 = vmax.f32 %v1436_v21, 0.0  ;;  %v1435_v13 = vmul.f32 %v1821_v52, %v1433_v23 }
 0x67c   :  { %2143 = vmatprep.mubr.f32.mxu1 %v1438_v5  ;;  %v1437_v8 = vadd.f32 %v1822_v9, %v1435_v13 }
 0x67d   :  { %2249 = vmatpush3.bf16.msra.mxu0 %v2951_v39 }
 0x67e   :  { %2251 = vmatprep.subr.bf16.mxu0 %v2250_v28  ;;  %v1439_v1 = vmax.f32 %v1437_v8, 0.0 }
 0x680   :  { %2144 = vmatmul.mubr.f32.vlgmr.msra.gmra.mrb[34].mxu1 %v1439_v1 }
 0x681   :  { %2253 = vmatpush3.bf16.msra.mxu0 %v2250_v28 }
 0x682   :  { %2299 = vmatprep.subr.bf16.mxu0 %v2746_v19 }
 0x684   :  { %2046 = vmatmul.mubr.f32.vlgmr.msra.gmra.mrb[6].mxu0 %v595_v25 }
 0x685   :  { %2301 = vmatpush3.bf16.msra.mxu0 %v2746_v19 }
 0x686   :  { %2303 = vmatprep.subr.bf16.mxu0 %v2762_v27 }
 0x689   :  { %2305 = vmatpush3.bf16.msra.mxu0 %v2762_v27 }
 0x68a   :  { %2307 = vmatprep.subr.bf16.mxu0 %v2775_v53 }
 0x68d   :  { %2309 = vmatpush3.bf16.msra.mxu0 %v2775_v53 }
 0x68e   :  { %2311 = vmatprep.subr.bf16.mxu0 %v2790_v37 }
 0x691   :  { %2313 = vmatpush3.bf16.msra.mxu0 %v2790_v37 }
 0x692   :  { %2315 = vmatprep.subr.bf16.mxu0 %v2803_v42 }
 0x695   :  { %2317 = vmatpush3.bf16.msra.mxu0 %v2803_v42 }
 0x696   :  { %2319 = vmatprep.subr.bf16.mxu0 %v2815_v47 }
 0x699   :  { %2321 = vmatpush3.bf16.msra.mxu0 %v2815_v47 }
 0x69a   :  { %2323 = vmatprep.subr.bf16.mxu0 %v2827_v48 }
 0x69d   :  { %2325 = vmatpush3.bf16.msra.mxu0 %v2827_v48 }
 0x69e   :  { %2327 = vmatprep.subr.bf16.mxu0 %v2837_v55 }
 0x6a1   :  { %2329 = vmatpush3.bf16.msra.mxu0 %v2837_v55 }
 0x6dc   :  { %v1529_v32 = vpop.xlane.xlu0 %1528 }
 0x6dd   :  { %v1639_v11 = vmul.f32 1e-05, %v1529_v32 }
 0x6df   :  { %v1641_v46 = vmul.f32 %v1639_v11, %v1529_v32 }
 0x6e0   :  { %v1532_v6 = vpop.xlane.xlu0 %1531 }
 0x6e1   :  { %v1640_v49 = vmul.f32 1e-05, %v1532_v6 }
 0x6e3   :  { %v1642_v59 = vmul.f32 %v1640_v49, %v1532_v6 }
 0x722   :  { %v2075_v19 = vpop.f32.mrb[32].mxu1 }
 0x723   :  { %v1608_v27 = vpop.f32.mrb[33].mxu1  ;;  %v1619_v53 = vsel %vm467_vm1, %v2075_v19, 0.0  ;;  %v1625_v42 = vmul.f32 %v2075_v19, %v2075_v19 }
 0x724   :  { %1617 = vadd.xlane.f32.xlu1 %v1608_v27  ;;  %v1624_v37 = vmul.f32 %v1608_v27, %v1608_v27 }
 0x725   :  { %v1628_v24 = vsel %vm467_vm1, %v1625_v42, 0.0 }
 0x728   :  { %1620 = vadd.xlane.f32.xlu1 %v1619_v53 }
 0x72c   :  { %1626 = vadd.xlane.f32.xlu1 %v1624_v37 }
 0x730   :  { %1629 = vadd.xlane.f32.xlu1 %v1628_v24 }
 0x753   :  { %v2145_v47 = vpop.f32.mrb[34].mxu1 }
 0x754   :  { %v1796_v30 = vpop.f32.mrb[35].mxu1 }
 0x757   :  { %v2047_v48 = vpop.f32.mrb[6].mxu0 }
 0x758   :  { %975 = vst.msk [vmem:[%s3033_s7 + $0x8] sm:$0xf] %vm974_vm6, %v2047_v48  ;;  %v964_v55 = vpop.f32.mrb[7].mxu0 }
 0x759   :  { %973 = vst.msk [vmem:[%s3033_s7] sm:$0xff] %vm128_vm0, %v964_v55 }
 0x7b1   :  { %v1618_v10 = vpop.xlane.xlu1 %1617 }
 0x7b2   :  { %v1622_v35 = vmul.f32 0.0625, %v1618_v10 }
 0x7b4   :  { %v1633_v40 = vmul.f32 %v1622_v35, %v1622_v35  ;;  %v1637_v61 = vsub.f32 %v1608_v27, %v1622_v35 }
 0x7b5   :  { %v1621_v34 = vpop.xlane.xlu1 %1620 }
 0x7b6   :  { %v1623_v41 = vmul.f32 0.0625, %v1621_v34 }
 0x7b8   :  { %v1634_v54 = vmul.f32 %v1623_v41, %v1623_v41  ;;  %v1638_v9 = vsub.f32 %v2075_v19, %v1623_v41 }
 0x7b9   :  { %v1627_v39 = vpop.xlane.xlu1 %1626 }
 0x7ba   :  { %v1631_v45 = vmul.f32 0.0625, %v1627_v39 }
 0x7bc   :  { %v1635_v50 = vsub.f32 %v1631_v45, %v1633_v40 }
 0x7bd   :  { %v1630_v51 = vpop.xlane.xlu1 %1629 }
 0x7be   :  { %v1643_v52 = vadd.f32 %v1641_v46, %v1635_v50  ;;  %v1632_v56 = vmul.f32 0.0625, %v1630_v51 }
 0x7c0   :  { %2396 = vrsqrt.f32 %v1643_v52  ;;  %v1636_v60 = vsub.f32 %v1632_v56, %v1634_v54 }
 0x7c2   :  { %v1644_v28 = vadd.f32 %v1642_v59, %v1636_v60 }
 0x7c4   :  { %2398 = vrsqrt.f32 %v1644_v28 }
 0x7ca   :  { %v2397_v62 = vpop.eup %2396 }
 0x7cb   :  { %v1647_v63 = vmul.f32 %v2397_v62, %v1637_v61 }
 0x7cd   :  { %v1649_v44 = vmul.f32 %v2908_v0, %v1647_v63 }
 0x7ce   :  { %v2399_v7 = vpop.eup %2398 }
 0x7cf   :  { %v1651_v22 = vadd.f32 %v2914_v17, %v1649_v44  ;;  %v1648_v2 = vmul.f32 %v2399_v7, %v1638_v9 }
 0x7d1   :  { %v1653_v29 = vmax.f32 %v1651_v22, 0.0  ;;  %v1650_v12 = vmul.f32 %v2908_v0, %v1648_v2 }
 0x7d3   :  { %2108 = vmatprep.mubr.f32.mxu0 %v1653_v29  ;;  %v1652_v33 = vadd.f32 %v2914_v17, %v1650_v12 }
 0x7d5   :  { %v1654_v58 = vmax.f32 %v1652_v33, 0.0 }
 0x7d7   :  { %2109 = vmatmul.mubr.f32.vlgmr.msra.gmra.mrb[8].mxu0 %v1654_v58 }
 0x8aa   :  { %v2110_v36 = vpop.f32.mrb[8].mxu0 }
 0x8ab   :  { %v1802_v18 = vadd.f32 %v2145_v47, %v2110_v36  ;;  %v1721_v3 = vpop.f32.mrb[9].mxu0 }
 0x8ac   :  { %v1797_v38 = vadd.f32 %v1796_v30, %v1721_v3 }
 0x8ad   :  { %1845 = vst.msk [vmem:[%s3033_s7 + $0x18] sm:$0xf] %vm974_vm6, %v1802_v18 }
 0x8ae   :  { %1844 = vst.msk [vmem:[%s3033_s7 + $0x10] sm:$0xff] %vm128_vm0, %v1797_v38 }

</bundles_post_ra>
